<compile_context>
chip_gen: v7x
topology: tpu7x:2x2x1
jax: 0.10.0
libtpu: 0.0.40
codegen_flags: <defaults>
</compile_context>

<pallas_src>
import functools

import jax
import jax.numpy as jnp
import numpy as np
from jax.experimental import pallas as pl
from jax.experimental.pallas import tpu as pltpu


def granger_rnn_kernel(x_ref, w_ref, u_ref, b_ref, bhn_ref,
                       lf_ref, fcw_ref, sel_ref, fcb_ref,
                       out_ref, gi_ref, *, Bp, L, MHp):
    # x_ref   : (L*Bp, F)      shared input, row index = t*Bp + b (timestep-contiguous)
    # w_ref   : (F, 3*MHp)     fused W_i{r|z|n}^T per model packed along lanes,
    #                          feature filter folded in, padded lanes zero
    # u_ref   : (MHp, 3*MHp)   fused W_h{r|z|n}^T, block-diagonal across models
    # b_ref   : (1, 3*MHp)     [b_ir+b_hr | b_iz+b_hz | b_in]
    # bhn_ref : (1, MHp)       b_hn (kept separate: n uses r * (W_hn h + b_hn))
    # lf_ref  : (L*Bp, 3*MHp)  lags filter broadcast to the fused gi layout
    # fcw_ref : (L*Bp, MHp)    final Linear weight, pre-broadcast per (t, b) row
    # sel_ref : (MHp, Mp)      group-sum selector (1 where column m owns lane m*H+j)
    # fcb_ref : (1, Mp)        final Linear bias (padded with zeros)
    # out_ref : (Bp, Mp)       lane-dense output slab
    # gi_ref  : (L*Bp, 3*MHp)  VMEM scratch for the hoisted input projection

    # Hoisted, fused input projection for all timesteps / models / gates.
    # (res = x * ff * lf) @ W_ih^T == lf * (x @ (ff ⊙ W_ih^T)).
    gi_ref[...] = (jnp.dot(x_ref[...], w_ref[...],
                           preferred_element_type=jnp.float32)
                   * lf_ref[...] + b_ref[...])

    u = u_ref[...]                                     # (MHp, 3*MHp)
    bhn = bhn_ref[...]                                 # (1, MHp)

    h = jnp.zeros((Bp, MHp), jnp.float32)
    acc = jnp.zeros((Bp, MHp), jnp.float32)            # running FC accumulator

    # Only h @ U remains on the serial path: ONE fused matmul per timestep.
    # L is small and static -> unroll so every slice below is static & aligned
    # (rows at multiples of Bp=8 sublanes, gates at multiples of MHp=128 lanes).
    for t in range(L):
        lo, hi = t * Bp, (t + 1) * Bp
        gh = jnp.dot(h, u, preferred_element_type=jnp.float32)   # (Bp, 3*MHp)
        gir = gi_ref[lo:hi, 0:MHp]
        giz = gi_ref[lo:hi, MHp:2 * MHp]
        gin = gi_ref[lo:hi, 2 * MHp:3 * MHp]
        r = jax.nn.sigmoid(gir + gh[:, 0:MHp])
        z = jax.nn.sigmoid(giz + gh[:, MHp:2 * MHp])
        n = jnp.tanh(gin + r * (gh[:, 2 * MHp:3 * MHp] + bhn))
        h = (1.0 - z) * n + z * h
        # Flatten + Linear(L*H, 1) folded into the loop as a tile-aligned VPU FMA.
        acc = acc + h * fcw_ref[lo:hi, :]

    # Segmented sum over each model's H lanes via one tiny selector matmul
    # (avoids an in-kernel lane->sublane reshape), then add the FC bias.
    out = jnp.dot(acc, sel_ref[...], preferred_element_type=jnp.float32) + fcb_ref[...]
    out_ref[...] = out.astype(out_ref.dtype)


def pack_params(raw, *, B, L, F, H, M, lane=128, sublane=8):
    """Fold filters into weights, fuse the three GRU gates, pack all M models along
    the lane axis, and zero-pad to lane/sublane tile boundaries."""
    MH = M * H
    MHp = ((MH + lane - 1) // lane) * lane
    Bp = ((B + sublane - 1) // sublane) * sublane
    Mp = ((M + lane - 1) // lane) * lane

    ff = raw["ff"]                      # (M, F)
    lf = raw["lf"][..., 0]              # (M, L)
    wih, whh = raw["wih"], raw["whh"]   # (M, 3H, F), (M, 3H, H)
    bih, bhh = raw["bih"], raw["bhh"]   # (M, 3H)

    def gate(w, k):                     # PyTorch gate order: r, z, n
        return w[:, k * H:(k + 1) * H]

    def pack_ih(wg):                    # (M, H, F) -> (F, MHp), feature filter folded in
        wt = jnp.transpose(wg, (0, 2, 1)) * ff[:, :, None]       # (M, F, H)
        packed = jnp.transpose(wt, (1, 0, 2)).reshape(F, MH)
        return jnp.pad(packed, ((0, 0), (0, MHp - MH)))

    def pack_hh(wg):                    # (M, H, H) -> (MHp, MHp) block-diagonal
        wt = jnp.transpose(wg, (0, 2, 1))                        # (M, H_in, H_out)
        eye = jnp.eye(M, dtype=wt.dtype)
        blk = jnp.einsum("mij,mn->minj", wt, eye).reshape(MH, MH)
        return jnp.pad(blk, ((0, MHp - MH), (0, MHp - MH)))

    def pad_lanes(v):                   # (1, MH) -> (1, MHp)
        return jnp.pad(v, ((0, 0), (0, MHp - MH)))

    # Fused gate weights: [r | z | n] along the lane axis, each block MHp wide.
    w_all = jnp.concatenate([pack_ih(gate(wih, k)) for k in range(3)], axis=1)  # (F, 3*MHp)
    u_all = jnp.concatenate([pack_hh(gate(whh, k)) for k in range(3)], axis=1)  # (MHp, 3*MHp)

    br = pad_lanes((gate(bih, 0) + gate(bhh, 0)).reshape(1, MH))
    bz = pad_lanes((gate(bih, 1) + gate(bhh, 1)).reshape(1, MH))
    bin_ = pad_lanes(gate(bih, 2).reshape(1, MH))
    bhn = pad_lanes(gate(bhh, 2).reshape(1, MH))
    bias_all = jnp.concatenate([br, bz, bin_], axis=1)                          # (1, 3*MHp)

    # Lags filter broadcast to the (L*Bp, MHp) gi layout (row = t*Bp + b),
    # then tiled across the three gate blocks. Padded lanes are zero (finite).
    lf_lm = jnp.transpose(lf, (1, 0))                                           # (L, M)
    lf_lmh = jnp.repeat(lf_lm[:, :, None], H, axis=2).reshape(L, MH)
    lf_lmh = jnp.pad(lf_lmh, ((0, 0), (0, MHp - MH)))
    lf_full = jnp.repeat(lf_lmh[:, None, :], Bp, axis=1).reshape(L * Bp, MHp)
    lf3 = jnp.tile(lf_full, (1, 3))                                             # (L*Bp, 3*MHp)

    # Final Linear weight (M, 1, L*H) -> per-timestep lane-dense, pre-broadcast
    # over the padded batch so the in-loop FMA needs no broadcast.
    fcw_lmh = jnp.transpose(raw["fcw"].reshape(M, L, H), (1, 0, 2)).reshape(L, MH)
    fcw_lmh = jnp.pad(fcw_lmh, ((0, 0), (0, MHp - MH)))
    fcw_full = jnp.repeat(fcw_lmh[:, None, :], Bp, axis=1).reshape(L * Bp, MHp)

    sel_small = jnp.repeat(jnp.eye(M, dtype=jnp.float32), H, axis=0)            # (MH, M)
    sel = jnp.pad(sel_small, ((0, MHp - MH), (0, Mp - M)))                      # (MHp, Mp)
    fcb = jnp.pad(raw["fcb"].reshape(1, M), ((0, 0), (0, Mp - M)))              # (1, Mp)

    packed = dict(w_all=w_all, u_all=u_all, bias_all=bias_all, bhn=bhn,
                  lf3=lf3, fcw=fcw_full, sel=sel, fcb=fcb)
    dims = dict(B=B, Bp=Bp, L=L, F=F, H=H, M=M, MHp=MHp, Mp=Mp)
    return packed, dims


def granger_rnn_forward(x, packed, dims):
    """x: (B, L, F) float32. Returns (B, M) like torch.stack(outs, dim=1).squeeze()."""
    B, L, F = x.shape
    Bp, MHp, Mp, M = dims["Bp"], dims["MHp"], dims["Mp"], dims["M"]

    # Zero-pad the batch to a sublane tile, then (Bp, L, F) -> (L*Bp, F) so each
    # timestep is a contiguous, sublane-aligned row block.
    x_pad = jnp.pad(x, ((0, Bp - B), (0, 0), (0, 0)))
    x_tb = jnp.transpose(x_pad, (1, 0, 2)).reshape(L * Bp, F)

    operands = (x_tb, packed["w_all"], packed["u_all"], packed["bias_all"],
                packed["bhn"], packed["lf3"], packed["fcw"], packed["sel"],
                packed["fcb"])

    def full_spec(shape):               # all operands are 2-D, whole-array blocks
        return pl.BlockSpec(shape, lambda i: (0, 0))

    kernel = functools.partial(granger_rnn_kernel, Bp=Bp, L=L, MHp=MHp)
    out = pl.pallas_call(
        kernel,
        out_shape=jax.ShapeDtypeStruct((Bp, Mp), jnp.float32),
        grid=(1,),                      # all models fused into a single grid step
        in_specs=[full_spec(op.shape) for op in operands],
        out_specs=full_spec((Bp, Mp)),
        scratch_shapes=[pltpu.VMEM((L * Bp, 3 * MHp), jnp.float32)],
        compiler_params=pltpu.CompilerParams(
            dimension_semantics=("arbitrary",),
            vmem_limit_bytes=32 * 1024 * 1024),
    )(*operands)
    # NOTE: torch's .squeeze() would also drop the batch dim when B == 1; we
    # always return (B, M).
    return out[:B, :M]


def init_params(key, n_models, input_size, lags, hidden):
    """Per-model parameters in raw PyTorch shapes (stacked on a leading model axis)."""
    M, F, L, H = n_models, input_size, lags, hidden
    ks = jax.random.split(key, 8)
    s = 1.0 / float(np.sqrt(H))
    sf = 1.0 / float(np.sqrt(L * H))
    # FilteringLayer initializes its filter to ones; randomize around 1 so the
    # test actually exercises the filter-folding path.
    ff = jax.random.uniform(ks[0], (M, F), jnp.float32, 0.5, 1.5)
    lf = jax.random.uniform(ks[1], (M, L, 1), jnp.float32, 0.5, 1.5)
    wih = jax.random.uniform(ks[2], (M, 3 * H, F), jnp.float32, -s, s)
    whh = jax.random.uniform(ks[3], (M, 3 * H, H), jnp.float32, -s, s)
    bih = jax.random.uniform(ks[4], (M, 3 * H), jnp.float32, -s, s)
    bhh = jax.random.uniform(ks[5], (M, 3 * H), jnp.float32, -s, s)
    fcw = jax.random.uniform(ks[6], (M, 1, L * H), jnp.float32, -sf, sf)
    fcb = jax.random.uniform(ks[7], (M, 1), jnp.float32, -sf, sf)
    return dict(ff=ff, lf=lf, wih=wih, whh=whh, bih=bih, bhh=bhh, fcw=fcw, fcb=fcb)


def reference_forward(x, p):
    """Pure-JAX replica of GrangerRNN.forward (per-model GRU + Flatten + Linear)."""
    B, L, F = x.shape
    M = p["ff"].shape[0]
    H = p["whh"].shape[2]
    outs = []
    for m in range(M):
        res = x * p["ff"][m][None, None, :]              # feature filter
        res = res * p["lf"][m][None, :, :]               # lags filter (L, 1)
        wih_t = p["wih"][m].T                            # (F, 3H)
        whh_t = p["whh"][m].T                            # (H, 3H)
        bih, bhh = p["bih"][m], p["bhh"][m]
        h = jnp.zeros((B, H), jnp.float32)
        hs = []
        for t in range(L):
            gi = res[:, t, :] @ wih_t + bih
            gh = h @ whh_t + bhh
            r = jax.nn.sigmoid(gi[:, :H] + gh[:, :H])
            z = jax.nn.sigmoid(gi[:, H:2 * H] + gh[:, H:2 * H])
            n = jnp.tanh(gi[:, 2 * H:] + r * gh[:, 2 * H:])
            h = (1.0 - z) * n + z * h
            hs.append(h)
        flat = jnp.concatenate(hs, axis=1)               # Flatten of (B, L, H)
        outs.append(flat @ p["fcw"][m].T + p["fcb"][m])  # (B, 1)
    return jnp.stack(outs, axis=1)[:, :, 0]              # (B, M)


if __name__ == "__main__":
    # Granger causality: one model per predicted feature -> n_models == input_size.
    B, L, F, H = 4, 8, 6, 16
    M = F
    key = jax.random.PRNGKey(0)
    kx, kp = jax.random.split(key)
    x = jax.random.normal(kx, (B, L, F), dtype=jnp.float32)
    raw = init_params(kp, M, F, L, H)
    packed, dims = pack_params(raw, B=B, L=L, F=F, H=H, M=M)

    out = granger_rnn_forward(x, packed, dims)
    out = jax.block_until_ready(out)
    assert out.shape == (B, M), out.shape

    ref = reference_forward(x, raw)
    np.testing.assert_allclose(np.asarray(out), np.asarray(ref), rtol=1e-4, atol=1e-5)
    print("KERNEL_OK")
</pallas_src>

<mosaic_0001>
module attributes {stable_mosaic.version = 11 : i64} {
  func.func @granger_rnn_kernel(%arg0: i32, %arg1: memref<64x6xf32, #tpu.memory_space<vmem>>, %arg2: memref<6x384xf32, #tpu.memory_space<vmem>>, %arg3: memref<128x384xf32, #tpu.memory_space<vmem>>, %arg4: memref<1x384xf32, #tpu.memory_space<vmem>>, %arg5: memref<1x128xf32, #tpu.memory_space<vmem>>, %arg6: memref<64x384xf32, #tpu.memory_space<vmem>>, %arg7: memref<64x128xf32, #tpu.memory_space<vmem>>, %arg8: memref<128x128xf32, #tpu.memory_space<vmem>>, %arg9: memref<1x128xf32, #tpu.memory_space<vmem>>, %arg10: memref<8x128xf32, #tpu.memory_space<vmem>>, %arg11: memref<64x384xf32, #tpu.memory_space<vmem>>) attributes {dimension_semantics = [#tpu.dimension_semantics<arbitrary>], iteration_bounds = array<i64: 1>, scalar_prefetch = 0 : i64, scratch_operands = 1 : i64, tpu.core_type = #tpu.core_type<tc>, window_params = [{pipeline_mode = #tpu.pipeline_mode<synchronous>, transform_indices = @transform_0, window_bounds = array<i64: 64, 6>}, {pipeline_mode = #tpu.pipeline_mode<synchronous>, transform_indices = @transform_1, window_bounds = array<i64: 6, 384>}, {pipeline_mode = #tpu.pipeline_mode<synchronous>, transform_indices = @transform_2, window_bounds = array<i64: 128, 384>}, {pipeline_mode = #tpu.pipeline_mode<synchronous>, transform_indices = @transform_3, window_bounds = array<i64: 1, 384>}, {pipeline_mode = #tpu.pipeline_mode<synchronous>, transform_indices = @transform_4, window_bounds = array<i64: 1, 128>}, {pipeline_mode = #tpu.pipeline_mode<synchronous>, transform_indices = @transform_5, window_bounds = array<i64: 64, 384>}, {pipeline_mode = #tpu.pipeline_mode<synchronous>, transform_indices = @transform_6, window_bounds = array<i64: 64, 128>}, {pipeline_mode = #tpu.pipeline_mode<synchronous>, transform_indices = @transform_7, window_bounds = array<i64: 128, 128>}, {pipeline_mode = #tpu.pipeline_mode<synchronous>, transform_indices = @transform_8, window_bounds = array<i64: 1, 128>}, {pipeline_mode = #tpu.pipeline_mode<synchronous>, transform_indices = @transform_9, window_bounds = array<i64: 8, 128>}]} {
    %c0 = arith.constant 0 : index
    %c0_0 = arith.constant 0 : index
    %0 = vector.load %arg1[%c0, %c0_0] : memref<64x6xf32, #tpu.memory_space<vmem>>, vector<64x6xf32>
    %c0_1 = arith.constant 0 : index
    %c0_2 = arith.constant 0 : index
    %1 = vector.load %arg2[%c0_1, %c0_2] : memref<6x384xf32, #tpu.memory_space<vmem>>, vector<6x384xf32>
    %cst = arith.constant dense<0.000000e+00> : vector<64x384xf32>
    %2 = tpu.matmul %0, %1, %cst {dimension_numbers = #tpu.dot_dimension_numbers<[1], [0], [0], [1], [0, 0, 1, 1], [], []>} : vector<64x6xf32>, vector<6x384xf32>, vector<64x384xf32> -> vector<64x384xf32>
    %c0_3 = arith.constant 0 : index
    %c0_4 = arith.constant 0 : index
    %3 = vector.load %arg6[%c0_3, %c0_4] : memref<64x384xf32, #tpu.memory_space<vmem>>, vector<64x384xf32>
    %4 = arith.mulf %2, %3 : vector<64x384xf32>
    %c0_5 = arith.constant 0 : index
    %c0_6 = arith.constant 0 : index
    %5 = vector.load %arg4[%c0_5, %c0_6] : memref<1x384xf32, #tpu.memory_space<vmem>>, vector<1x384xf32>
    %6 = vector.broadcast %5 : vector<1x384xf32> to vector<64x384xf32>
    %7 = arith.addf %4, %6 : vector<64x384xf32>
    %c0_7 = arith.constant 0 : index
    %c0_8 = arith.constant 0 : index
    %8 = vector.load %arg11[%c0_7, %c0_8] : memref<64x384xf32, #tpu.memory_space<vmem>>, vector<64x384xf32>
    tpu.vector_store %arg11[%c0_7, %c0_8], %7 {strides = array<i32>} : memref<64x384xf32, #tpu.memory_space<vmem>>, vector<64x384xf32>,
    %c0_9 = arith.constant 0 : index
    %c0_10 = arith.constant 0 : index
    %9 = vector.load %arg3[%c0_9, %c0_10] : memref<128x384xf32, #tpu.memory_space<vmem>>, vector<128x384xf32>
    %c0_11 = arith.constant 0 : index
    %c0_12 = arith.constant 0 : index
    %10 = vector.load %arg5[%c0_11, %c0_12] : memref<1x128xf32, #tpu.memory_space<vmem>>, vector<1x128xf32>
    %cst_13 = arith.constant 0.000000e+00 : f32
    %11 = vector.broadcast %cst_13 : f32 to vector<8x128xf32>
    %cst_14 = arith.constant 0.000000e+00 : f32
    %12 = vector.broadcast %cst_14 : f32 to vector<8x128xf32>
    %cst_15 = arith.constant dense<0.000000e+00> : vector<8x384xf32>
    %13 = tpu.matmul %11, %9, %cst_15 {dimension_numbers = #tpu.dot_dimension_numbers<[1], [0], [0], [1], [0, 0, 1, 1], [], []>} : vector<8x128xf32>, vector<128x384xf32>, vector<8x384xf32> -> vector<8x384xf32>
    %c0_16 = arith.constant 0 : index
    %c0_17 = arith.constant 0 : index
    %14 = vector.load %arg11[%c0_16, %c0_17] : memref<64x384xf32, #tpu.memory_space<vmem>>, vector<8x128xf32>
    %c0_18 = arith.constant 0 : index
    %c128 = arith.constant 128 : index
    %15 = vector.load %arg11[%c0_18, %c128] : memref<64x384xf32, #tpu.memory_space<vmem>>, vector<8x128xf32>
    %c0_19 = arith.constant 0 : index
    %c256 = arith.constant 256 : index
    %16 = vector.load %arg11[%c0_19, %c256] : memref<64x384xf32, #tpu.memory_space<vmem>>, vector<8x128xf32>
    %17 = vector.extract_strided_slice %13 {offsets = [0, 0], sizes = [8, 128], strides = [1, 1]} : vector<8x384xf32> to vector<8x128xf32>
    %18 = arith.addf %14, %17 : vector<8x128xf32>
    %19 = arith.negf %18 : vector<8x128xf32>
    %20 = math.exp %19 : vector<8x128xf32>
    %cst_20 = arith.constant 1.000000e+00 : f32
    %21 = vector.broadcast %cst_20 : f32 to vector<8x128xf32>
    %22 = arith.addf %21, %20 : vector<8x128xf32>
    %23 = arith.divf %21, %22 : vector<8x128xf32>
    %24 = vector.extract_strided_slice %13 {offsets = [0, 128], sizes = [8, 128], strides = [1, 1]} : vector<8x384xf32> to vector<8x128xf32>
    %25 = arith.addf %15, %24 : vector<8x128xf32>
    %26 = arith.negf %25 : vector<8x128xf32>
    %27 = math.exp %26 : vector<8x128xf32>
    %cst_21 = arith.constant 1.000000e+00 : f32
    %28 = vector.broadcast %cst_21 : f32 to vector<8x128xf32>
    %29 = arith.addf %28, %27 : vector<8x128xf32>
    %30 = arith.divf %28, %29 : vector<8x128xf32>
    %31 = vector.extract_strided_slice %13 {offsets = [0, 256], sizes = [8, 128], strides = [1, 1]} : vector<8x384xf32> to vector<8x128xf32>
    %32 = vector.broadcast %10 : vector<1x128xf32> to vector<8x128xf32>
    %33 = arith.addf %31, %32 : vector<8x128xf32>
    %34 = arith.mulf %23, %33 : vector<8x128xf32>
    %35 = arith.addf %16, %34 : vector<8x128xf32>
    %36 = math.tanh %35 : vector<8x128xf32>
    %cst_22 = arith.constant 1.000000e+00 : f32
    %37 = vector.broadcast %cst_22 : f32 to vector<8x128xf32>
    %38 = arith.subf %37, %30 : vector<8x128xf32>
    %39 = arith.mulf %38, %36 : vector<8x128xf32>
    %40 = arith.mulf %30, %11 : vector<8x128xf32>
    %41 = arith.addf %39, %40 : vector<8x128xf32>
    %c0_23 = arith.constant 0 : index
    %c0_24 = arith.constant 0 : index
    %42 = vector.load %arg7[%c0_23, %c0_24] : memref<64x128xf32, #tpu.memory_space<vmem>>, vector<8x128xf32>
    %43 = arith.mulf %41, %42 : vector<8x128xf32>
    %44 = arith.addf %12, %43 : vector<8x128xf32>
    %cst_25 = arith.constant dense<0.000000e+00> : vector<8x384xf32>
    %45 = tpu.matmul %41, %9, %cst_25 {dimension_numbers = #tpu.dot_dimension_numbers<[1], [0], [0], [1], [0, 0, 1, 1], [], []>} : vector<8x128xf32>, vector<128x384xf32>, vector<8x384xf32> -> vector<8x384xf32>
    %c8 = arith.constant 8 : index
    %c0_26 = arith.constant 0 : index
    %46 = vector.load %arg11[%c8, %c0_26] : memref<64x384xf32, #tpu.memory_space<vmem>>, vector<8x128xf32>
    %c8_27 = arith.constant 8 : index
    %c128_28 = arith.constant 128 : index
    %47 = vector.load %arg11[%c8_27, %c128_28] : memref<64x384xf32, #tpu.memory_space<vmem>>, vector<8x128xf32>
    %c8_29 = arith.constant 8 : index
    %c256_30 = arith.constant 256 : index
    %48 = vector.load %arg11[%c8_29, %c256_30] : memref<64x384xf32, #tpu.memory_space<vmem>>, vector<8x128xf32>
    %49 = vector.extract_strided_slice %45 {offsets = [0, 0], sizes = [8, 128], strides = [1, 1]} : vector<8x384xf32> to vector<8x128xf32>
    %50 = arith.addf %46, %49 : vector<8x128xf32>
    %51 = arith.negf %50 : vector<8x128xf32>
    %52 = math.exp %51 : vector<8x128xf32>
    %cst_31 = arith.constant 1.000000e+00 : f32
    %53 = vector.broadcast %cst_31 : f32 to vector<8x128xf32>
    %54 = arith.addf %53, %52 : vector<8x128xf32>
    %55 = arith.divf %53, %54 : vector<8x128xf32>
    %56 = vector.extract_strided_slice %45 {offsets = [0, 128], sizes = [8, 128], strides = [1, 1]} : vector<8x384xf32> to vector<8x128xf32>
    %57 = arith.addf %47, %56 : vector<8x128xf32>
    %58 = arith.negf %57 : vector<8x128xf32>
    %59 = math.exp %58 : vector<8x128xf32>
    %cst_32 = arith.constant 1.000000e+00 : f32
    %60 = vector.broadcast %cst_32 : f32 to vector<8x128xf32>
    %61 = arith.addf %60, %59 : vector<8x128xf32>
    %62 = arith.divf %60, %61 : vector<8x128xf32>
    %63 = vector.extract_strided_slice %45 {offsets = [0, 256], sizes = [8, 128], strides = [1, 1]} : vector<8x384xf32> to vector<8x128xf32>
    %64 = vector.broadcast %10 : vector<1x128xf32> to vector<8x128xf32>
    %65 = arith.addf %63, %64 : vector<8x128xf32>
    %66 = arith.mulf %55, %65 : vector<8x128xf32>
    %67 = arith.addf %48, %66 : vector<8x128xf32>
    %68 = math.tanh %67 : vector<8x128xf32>
    %cst_33 = arith.constant 1.000000e+00 : f32
    %69 = vector.broadcast %cst_33 : f32 to vector<8x128xf32>
    %70 = arith.subf %69, %62 : vector<8x128xf32>
    %71 = arith.mulf %70, %68 : vector<8x128xf32>
    %72 = arith.mulf %62, %41 : vector<8x128xf32>
    %73 = arith.addf %71, %72 : vector<8x128xf32>
    %c8_34 = arith.constant 8 : index
    %c0_35 = arith.constant 0 : index
    %74 = vector.load %arg7[%c8_34, %c0_35] : memref<64x128xf32, #tpu.memory_space<vmem>>, vector<8x128xf32>
    %75 = arith.mulf %73, %74 : vector<8x128xf32>
    %76 = arith.addf %44, %75 : vector<8x128xf32>
    %cst_36 = arith.constant dense<0.000000e+00> : vector<8x384xf32>
    %77 = tpu.matmul %73, %9, %cst_36 {dimension_numbers = #tpu.dot_dimension_numbers<[1], [0], [0], [1], [0, 0, 1, 1], [], []>} : vector<8x128xf32>, vector<128x384xf32>, vector<8x384xf32> -> vector<8x384xf32>
    %c16 = arith.constant 16 : index
    %c0_37 = arith.constant 0 : index
    %78 = vector.load %arg11[%c16, %c0_37] : memref<64x384xf32, #tpu.memory_space<vmem>>, vector<8x128xf32>
    %c16_38 = arith.constant 16 : index
    %c128_39 = arith.constant 128 : index
    %79 = vector.load %arg11[%c16_38, %c128_39] : memref<64x384xf32, #tpu.memory_space<vmem>>, vector<8x128xf32>
    %c16_40 = arith.constant 16 : index
    %c256_41 = arith.constant 256 : index
    %80 = vector.load %arg11[%c16_40, %c256_41] : memref<64x384xf32, #tpu.memory_space<vmem>>, vector<8x128xf32>
    %81 = vector.extract_strided_slice %77 {offsets = [0, 0], sizes = [8, 128], strides = [1, 1]} : vector<8x384xf32> to vector<8x128xf32>
    %82 = arith.addf %78, %81 : vector<8x128xf32>
    %83 = arith.negf %82 : vector<8x128xf32>
    %84 = math.exp %83 : vector<8x128xf32>
    %cst_42 = arith.constant 1.000000e+00 : f32
    %85 = vector.broadcast %cst_42 : f32 to vector<8x128xf32>
    %86 = arith.addf %85, %84 : vector<8x128xf32>
    %87 = arith.divf %85, %86 : vector<8x128xf32>
    %88 = vector.extract_strided_slice %77 {offsets = [0, 128], sizes = [8, 128], strides = [1, 1]} : vector<8x384xf32> to vector<8x128xf32>
    %89 = arith.addf %79, %88 : vector<8x128xf32>
    %90 = arith.negf %89 : vector<8x128xf32>
    %91 = math.exp %90 : vector<8x128xf32>
    %cst_43 = arith.constant 1.000000e+00 : f32
    %92 = vector.broadcast %cst_43 : f32 to vector<8x128xf32>
    %93 = arith.addf %92, %91 : vector<8x128xf32>
    %94 = arith.divf %92, %93 : vector<8x128xf32>
    %95 = vector.extract_strided_slice %77 {offsets = [0, 256], sizes = [8, 128], strides = [1, 1]} : vector<8x384xf32> to vector<8x128xf32>
    %96 = vector.broadcast %10 : vector<1x128xf32> to vector<8x128xf32>
    %97 = arith.addf %95, %96 : vector<8x128xf32>
    %98 = arith.mulf %87, %97 : vector<8x128xf32>
    %99 = arith.addf %80, %98 : vector<8x128xf32>
    %100 = math.tanh %99 : vector<8x128xf32>
    %cst_44 = arith.constant 1.000000e+00 : f32
    %101 = vector.broadcast %cst_44 : f32 to vector<8x128xf32>
    %102 = arith.subf %101, %94 : vector<8x128xf32>
    %103 = arith.mulf %102, %100 : vector<8x128xf32>
    %104 = arith.mulf %94, %73 : vector<8x128xf32>
    %105 = arith.addf %103, %104 : vector<8x128xf32>
    %c16_45 = arith.constant 16 : index
    %c0_46 = arith.constant 0 : index
    %106 = vector.load %arg7[%c16_45, %c0_46] : memref<64x128xf32, #tpu.memory_space<vmem>>, vector<8x128xf32>
    %107 = arith.mulf %105, %106 : vector<8x128xf32>
    %108 = arith.addf %76, %107 : vector<8x128xf32>
    %cst_47 = arith.constant dense<0.000000e+00> : vector<8x384xf32>
    %109 = tpu.matmul %105, %9, %cst_47 {dimension_numbers = #tpu.dot_dimension_numbers<[1], [0], [0], [1], [0, 0, 1, 1], [], []>} : vector<8x128xf32>, vector<128x384xf32>, vector<8x384xf32> -> vector<8x384xf32>
    %c24 = arith.constant 24 : index
    %c0_48 = arith.constant 0 : index
    %110 = vector.load %arg11[%c24, %c0_48] : memref<64x384xf32, #tpu.memory_space<vmem>>, vector<8x128xf32>
    %c24_49 = arith.constant 24 : index
    %c128_50 = arith.constant 128 : index
    %111 = vector.load %arg11[%c24_49, %c128_50] : memref<64x384xf32, #tpu.memory_space<vmem>>, vector<8x128xf32>
    %c24_51 = arith.constant 24 : index
    %c256_52 = arith.constant 256 : index
    %112 = vector.load %arg11[%c24_51, %c256_52] : memref<64x384xf32, #tpu.memory_space<vmem>>, vector<8x128xf32>
    %113 = vector.extract_strided_slice %109 {offsets = [0, 0], sizes = [8, 128], strides = [1, 1]} : vector<8x384xf32> to vector<8x128xf32>
    %114 = arith.addf %110, %113 : vector<8x128xf32>
    %115 = arith.negf %114 : vector<8x128xf32>
    %116 = math.exp %115 : vector<8x128xf32>
    %cst_53 = arith.constant 1.000000e+00 : f32
    %117 = vector.broadcast %cst_53 : f32 to vector<8x128xf32>
    %118 = arith.addf %117, %116 : vector<8x128xf32>
    %119 = arith.divf %117, %118 : vector<8x128xf32>
    %120 = vector.extract_strided_slice %109 {offsets = [0, 128], sizes = [8, 128], strides = [1, 1]} : vector<8x384xf32> to vector<8x128xf32>
    %121 = arith.addf %111, %120 : vector<8x128xf32>
    %122 = arith.negf %121 : vector<8x128xf32>
    %123 = math.exp %122 : vector<8x128xf32>
    %cst_54 = arith.constant 1.000000e+00 : f32
    %124 = vector.broadcast %cst_54 : f32 to vector<8x128xf32>
    %125 = arith.addf %124, %123 : vector<8x128xf32>
    %126 = arith.divf %124, %125 : vector<8x128xf32>
    %127 = vector.extract_strided_slice %109 {offsets = [0, 256], sizes = [8, 128], strides = [1, 1]} : vector<8x384xf32> to vector<8x128xf32>
    %128 = vector.broadcast %10 : vector<1x128xf32> to vector<8x128xf32>
    %129 = arith.addf %127, %128 : vector<8x128xf32>
    %130 = arith.mulf %119, %129 : vector<8x128xf32>
    %131 = arith.addf %112, %130 : vector<8x128xf32>
    %132 = math.tanh %131 : vector<8x128xf32>
    %cst_55 = arith.constant 1.000000e+00 : f32
    %133 = vector.broadcast %cst_55 : f32 to vector<8x128xf32>
    %134 = arith.subf %133, %126 : vector<8x128xf32>
    %135 = arith.mulf %134, %132 : vector<8x128xf32>
    %136 = arith.mulf %126, %105 : vector<8x128xf32>
    %137 = arith.addf %135, %136 : vector<8x128xf32>
    %c24_56 = arith.constant 24 : index
    %c0_57 = arith.constant 0 : index
    %138 = vector.load %arg7[%c24_56, %c0_57] : memref<64x128xf32, #tpu.memory_space<vmem>>, vector<8x128xf32>
    %139 = arith.mulf %137, %138 : vector<8x128xf32>
    %140 = arith.addf %108, %139 : vector<8x128xf32>
    %cst_58 = arith.constant dense<0.000000e+00> : vector<8x384xf32>
    %141 = tpu.matmul %137, %9, %cst_58 {dimension_numbers = #tpu.dot_dimension_numbers<[1], [0], [0], [1], [0, 0, 1, 1], [], []>} : vector<8x128xf32>, vector<128x384xf32>, vector<8x384xf32> -> vector<8x384xf32>
    %c32 = arith.constant 32 : index
    %c0_59 = arith.constant 0 : index
    %142 = vector.load %arg11[%c32, %c0_59] : memref<64x384xf32, #tpu.memory_space<vmem>>, vector<8x128xf32>
    %c32_60 = arith.constant 32 : index
    %c128_61 = arith.constant 128 : index
    %143 = vector.load %arg11[%c32_60, %c128_61] : memref<64x384xf32, #tpu.memory_space<vmem>>, vector<8x128xf32>
    %c32_62 = arith.constant 32 : index
    %c256_63 = arith.constant 256 : index
    %144 = vector.load %arg11[%c32_62, %c256_63] : memref<64x384xf32, #tpu.memory_space<vmem>>, vector<8x128xf32>
    %145 = vector.extract_strided_slice %141 {offsets = [0, 0], sizes = [8, 128], strides = [1, 1]} : vector<8x384xf32> to vector<8x128xf32>
    %146 = arith.addf %142, %145 : vector<8x128xf32>
    %147 = arith.negf %146 : vector<8x128xf32>
    %148 = math.exp %147 : vector<8x128xf32>
    %cst_64 = arith.constant 1.000000e+00 : f32
    %149 = vector.broadcast %cst_64 : f32 to vector<8x128xf32>
    %150 = arith.addf %149, %148 : vector<8x128xf32>
    %151 = arith.divf %149, %150 : vector<8x128xf32>
    %152 = vector.extract_strided_slice %141 {offsets = [0, 128], sizes = [8, 128], strides = [1, 1]} : vector<8x384xf32> to vector<8x128xf32>
    %153 = arith.addf %143, %152 : vector<8x128xf32>
    %154 = arith.negf %153 : vector<8x128xf32>
    %155 = math.exp %154 : vector<8x128xf32>
    %cst_65 = arith.constant 1.000000e+00 : f32
    %156 = vector.broadcast %cst_65 : f32 to vector<8x128xf32>
    %157 = arith.addf %156, %155 : vector<8x128xf32>
    %158 = arith.divf %156, %157 : vector<8x128xf32>
    %159 = vector.extract_strided_slice %141 {offsets = [0, 256], sizes = [8, 128], strides = [1, 1]} : vector<8x384xf32> to vector<8x128xf32>
    %160 = vector.broadcast %10 : vector<1x128xf32> to vector<8x128xf32>
    %161 = arith.addf %159, %160 : vector<8x128xf32>
    %162 = arith.mulf %151, %161 : vector<8x128xf32>
    %163 = arith.addf %144, %162 : vector<8x128xf32>
    %164 = math.tanh %163 : vector<8x128xf32>
    %cst_66 = arith.constant 1.000000e+00 : f32
    %165 = vector.broadcast %cst_66 : f32 to vector<8x128xf32>
    %166 = arith.subf %165, %158 : vector<8x128xf32>
    %167 = arith.mulf %166, %164 : vector<8x128xf32>
    %168 = arith.mulf %158, %137 : vector<8x128xf32>
    %169 = arith.addf %167, %168 : vector<8x128xf32>
    %c32_67 = arith.constant 32 : index
    %c0_68 = arith.constant 0 : index
    %170 = vector.load %arg7[%c32_67, %c0_68] : memref<64x128xf32, #tpu.memory_space<vmem>>, vector<8x128xf32>
    %171 = arith.mulf %169, %170 : vector<8x128xf32>
    %172 = arith.addf %140, %171 : vector<8x128xf32>
    %cst_69 = arith.constant dense<0.000000e+00> : vector<8x384xf32>
    %173 = tpu.matmul %169, %9, %cst_69 {dimension_numbers = #tpu.dot_dimension_numbers<[1], [0], [0], [1], [0, 0, 1, 1], [], []>} : vector<8x128xf32>, vector<128x384xf32>, vector<8x384xf32> -> vector<8x384xf32>
    %c40 = arith.constant 40 : index
    %c0_70 = arith.constant 0 : index
    %174 = vector.load %arg11[%c40, %c0_70] : memref<64x384xf32, #tpu.memory_space<vmem>>, vector<8x128xf32>
    %c40_71 = arith.constant 40 : index
    %c128_72 = arith.constant 128 : index
    %175 = vector.load %arg11[%c40_71, %c128_72] : memref<64x384xf32, #tpu.memory_space<vmem>>, vector<8x128xf32>
    %c40_73 = arith.constant 40 : index
    %c256_74 = arith.constant 256 : index
    %176 = vector.load %arg11[%c40_73, %c256_74] : memref<64x384xf32, #tpu.memory_space<vmem>>, vector<8x128xf32>
    %177 = vector.extract_strided_slice %173 {offsets = [0, 0], sizes = [8, 128], strides = [1, 1]} : vector<8x384xf32> to vector<8x128xf32>
    %178 = arith.addf %174, %177 : vector<8x128xf32>
    %179 = arith.negf %178 : vector<8x128xf32>
    %180 = math.exp %179 : vector<8x128xf32>
    %cst_75 = arith.constant 1.000000e+00 : f32
    %181 = vector.broadcast %cst_75 : f32 to vector<8x128xf32>
    %182 = arith.addf %181, %180 : vector<8x128xf32>
    %183 = arith.divf %181, %182 : vector<8x128xf32>
    %184 = vector.extract_strided_slice %173 {offsets = [0, 128], sizes = [8, 128], strides = [1, 1]} : vector<8x384xf32> to vector<8x128xf32>
    %185 = arith.addf %175, %184 : vector<8x128xf32>
    %186 = arith.negf %185 : vector<8x128xf32>
    %187 = math.exp %186 : vector<8x128xf32>
    %cst_76 = arith.constant 1.000000e+00 : f32
    %188 = vector.broadcast %cst_76 : f32 to vector<8x128xf32>
    %189 = arith.addf %188, %187 : vector<8x128xf32>
    %190 = arith.divf %188, %189 : vector<8x128xf32>
    %191 = vector.extract_strided_slice %173 {offsets = [0, 256], sizes = [8, 128], strides = [1, 1]} : vector<8x384xf32> to vector<8x128xf32>
    %192 = vector.broadcast %10 : vector<1x128xf32> to vector<8x128xf32>
    %193 = arith.addf %191, %192 : vector<8x128xf32>
    %194 = arith.mulf %183, %193 : vector<8x128xf32>
    %195 = arith.addf %176, %194 : vector<8x128xf32>
    %196 = math.tanh %195 : vector<8x128xf32>
    %cst_77 = arith.constant 1.000000e+00 : f32
    %197 = vector.broadcast %cst_77 : f32 to vector<8x128xf32>
    %198 = arith.subf %197, %190 : vector<8x128xf32>
    %199 = arith.mulf %198, %196 : vector<8x128xf32>
    %200 = arith.mulf %190, %169 : vector<8x128xf32>
    %201 = arith.addf %199, %200 : vector<8x128xf32>
    %c40_78 = arith.constant 40 : index
    %c0_79 = arith.constant 0 : index
    %202 = vector.load %arg7[%c40_78, %c0_79] : memref<64x128xf32, #tpu.memory_space<vmem>>, vector<8x128xf32>
    %203 = arith.mulf %201, %202 : vector<8x128xf32>
    %204 = arith.addf %172, %203 : vector<8x128xf32>
    %cst_80 = arith.constant dense<0.000000e+00> : vector<8x384xf32>
    %205 = tpu.matmul %201, %9, %cst_80 {dimension_numbers = #tpu.dot_dimension_numbers<[1], [0], [0], [1], [0, 0, 1, 1], [], []>} : vector<8x128xf32>, vector<128x384xf32>, vector<8x384xf32> -> vector<8x384xf32>
    %c48 = arith.constant 48 : index
    %c0_81 = arith.constant 0 : index
    %206 = vector.load %arg11[%c48, %c0_81] : memref<64x384xf32, #tpu.memory_space<vmem>>, vector<8x128xf32>
    %c48_82 = arith.constant 48 : index
    %c128_83 = arith.constant 128 : index
    %207 = vector.load %arg11[%c48_82, %c128_83] : memref<64x384xf32, #tpu.memory_space<vmem>>, vector<8x128xf32>
    %c48_84 = arith.constant 48 : index
    %c256_85 = arith.constant 256 : index
    %208 = vector.load %arg11[%c48_84, %c256_85] : memref<64x384xf32, #tpu.memory_space<vmem>>, vector<8x128xf32>
    %209 = vector.extract_strided_slice %205 {offsets = [0, 0], sizes = [8, 128], strides = [1, 1]} : vector<8x384xf32> to vector<8x128xf32>
    %210 = arith.addf %206, %209 : vector<8x128xf32>
    %211 = arith.negf %210 : vector<8x128xf32>
    %212 = math.exp %211 : vector<8x128xf32>
    %cst_86 = arith.constant 1.000000e+00 : f32
    %213 = vector.broadcast %cst_86 : f32 to vector<8x128xf32>
    %214 = arith.addf %213, %212 : vector<8x128xf32>
    %215 = arith.divf %213, %214 : vector<8x128xf32>
    %216 = vector.extract_strided_slice %205 {offsets = [0, 128], sizes = [8, 128], strides = [1, 1]} : vector<8x384xf32> to vector<8x128xf32>
    %217 = arith.addf %207, %216 : vector<8x128xf32>
    %218 = arith.negf %217 : vector<8x128xf32>
    %219 = math.exp %218 : vector<8x128xf32>
    %cst_87 = arith.constant 1.000000e+00 : f32
    %220 = vector.broadcast %cst_87 : f32 to vector<8x128xf32>
    %221 = arith.addf %220, %219 : vector<8x128xf32>
    %222 = arith.divf %220, %221 : vector<8x128xf32>
    %223 = vector.extract_strided_slice %205 {offsets = [0, 256], sizes = [8, 128], strides = [1, 1]} : vector<8x384xf32> to vector<8x128xf32>
    %224 = vector.broadcast %10 : vector<1x128xf32> to vector<8x128xf32>
    %225 = arith.addf %223, %224 : vector<8x128xf32>
    %226 = arith.mulf %215, %225 : vector<8x128xf32>
    %227 = arith.addf %208, %226 : vector<8x128xf32>
    %228 = math.tanh %227 : vector<8x128xf32>
    %cst_88 = arith.constant 1.000000e+00 : f32
    %229 = vector.broadcast %cst_88 : f32 to vector<8x128xf32>
    %230 = arith.subf %229, %222 : vector<8x128xf32>
    %231 = arith.mulf %230, %228 : vector<8x128xf32>
    %232 = arith.mulf %222, %201 : vector<8x128xf32>
    %233 = arith.addf %231, %232 : vector<8x128xf32>
    %c48_89 = arith.constant 48 : index
    %c0_90 = arith.constant 0 : index
    %234 = vector.load %arg7[%c48_89, %c0_90] : memref<64x128xf32, #tpu.memory_space<vmem>>, vector<8x128xf32>
    %235 = arith.mulf %233, %234 : vector<8x128xf32>
    %236 = arith.addf %204, %235 : vector<8x128xf32>
    %cst_91 = arith.constant dense<0.000000e+00> : vector<8x384xf32>
    %237 = tpu.matmul %233, %9, %cst_91 {dimension_numbers = #tpu.dot_dimension_numbers<[1], [0], [0], [1], [0, 0, 1, 1], [], []>} : vector<8x128xf32>, vector<128x384xf32>, vector<8x384xf32> -> vector<8x384xf32>
    %c56 = arith.constant 56 : index
    %c0_92 = arith.constant 0 : index
    %238 = vector.load %arg11[%c56, %c0_92] : memref<64x384xf32, #tpu.memory_space<vmem>>, vector<8x128xf32>
    %c56_93 = arith.constant 56 : index
    %c128_94 = arith.constant 128 : index
    %239 = vector.load %arg11[%c56_93, %c128_94] : memref<64x384xf32, #tpu.memory_space<vmem>>, vector<8x128xf32>
    %c56_95 = arith.constant 56 : index
    %c256_96 = arith.constant 256 : index
    %240 = vector.load %arg11[%c56_95, %c256_96] : memref<64x384xf32, #tpu.memory_space<vmem>>, vector<8x128xf32>
    %241 = vector.extract_strided_slice %237 {offsets = [0, 0], sizes = [8, 128], strides = [1, 1]} : vector<8x384xf32> to vector<8x128xf32>
    %242 = arith.addf %238, %241 : vector<8x128xf32>
    %243 = arith.negf %242 : vector<8x128xf32>
    %244 = math.exp %243 : vector<8x128xf32>
    %cst_97 = arith.constant 1.000000e+00 : f32
    %245 = vector.broadcast %cst_97 : f32 to vector<8x128xf32>
    %246 = arith.addf %245, %244 : vector<8x128xf32>
    %247 = arith.divf %245, %246 : vector<8x128xf32>
    %248 = vector.extract_strided_slice %237 {offsets = [0, 128], sizes = [8, 128], strides = [1, 1]} : vector<8x384xf32> to vector<8x128xf32>
    %249 = arith.addf %239, %248 : vector<8x128xf32>
    %250 = arith.negf %249 : vector<8x128xf32>
    %251 = math.exp %250 : vector<8x128xf32>
    %cst_98 = arith.constant 1.000000e+00 : f32
    %252 = vector.broadcast %cst_98 : f32 to vector<8x128xf32>
    %253 = arith.addf %252, %251 : vector<8x128xf32>
    %254 = arith.divf %252, %253 : vector<8x128xf32>
    %255 = vector.extract_strided_slice %237 {offsets = [0, 256], sizes = [8, 128], strides = [1, 1]} : vector<8x384xf32> to vector<8x128xf32>
    %256 = vector.broadcast %10 : vector<1x128xf32> to vector<8x128xf32>
    %257 = arith.addf %255, %256 : vector<8x128xf32>
    %258 = arith.mulf %247, %257 : vector<8x128xf32>
    %259 = arith.addf %240, %258 : vector<8x128xf32>
    %260 = math.tanh %259 : vector<8x128xf32>
    %cst_99 = arith.constant 1.000000e+00 : f32
    %261 = vector.broadcast %cst_99 : f32 to vector<8x128xf32>
    %262 = arith.subf %261, %254 : vector<8x128xf32>
    %263 = arith.mulf %262, %260 : vector<8x128xf32>
    %264 = arith.mulf %254, %233 : vector<8x128xf32>
    %265 = arith.addf %263, %264 : vector<8x128xf32>
    %c56_100 = arith.constant 56 : index
    %c0_101 = arith.constant 0 : index
    %266 = vector.load %arg7[%c56_100, %c0_101] : memref<64x128xf32, #tpu.memory_space<vmem>>, vector<8x128xf32>
    %267 = arith.mulf %265, %266 : vector<8x128xf32>
    %268 = arith.addf %236, %267 : vector<8x128xf32>
    %c0_102 = arith.constant 0 : index
    %c0_103 = arith.constant 0 : index
    %269 = vector.load %arg8[%c0_102, %c0_103] : memref<128x128xf32, #tpu.memory_space<vmem>>, vector<128x128xf32>
    %cst_104 = arith.constant dense<0.000000e+00> : vector<8x128xf32>
    %270 = tpu.matmul %268, %269, %cst_104 {dimension_numbers = #tpu.dot_dimension_numbers<[1], [0], [0], [1], [0, 0, 1, 1], [], []>} : vector<8x128xf32>, vector<128x128xf32>, vector<8x128xf32> -> vector<8x128xf32>
    %c0_105 = arith.constant 0 : index
    %c0_106 = arith.constant 0 : index
    %271 = vector.load %arg9[%c0_105, %c0_106] : memref<1x128xf32, #tpu.memory_space<vmem>>, vector<1x128xf32>
    %272 = vector.broadcast %271 : vector<1x128xf32> to vector<8x128xf32>
    %273 = arith.addf %270, %272 : vector<8x128xf32>
    %c0_107 = arith.constant 0 : index
    %c0_108 = arith.constant 0 : index
    %274 = vector.load %arg10[%c0_107, %c0_108] : memref<8x128xf32, #tpu.memory_space<vmem>>, vector<8x128xf32>
    tpu.vector_store %arg10[%c0_107, %c0_108], %273 {strides = array<i32>} : memref<8x128xf32, #tpu.memory_space<vmem>>, vector<8x128xf32>,
    return
  }
  func.func @transform_0(%arg0: i32) -> (i32, i32) {
    %c0_i32 = arith.constant 0 : i32
    %c0_i32_0 = arith.constant 0 : i32
    %c0_i32_1 = arith.constant 0 : i32
    return %c0_i32, %c0_i32_0 : i32, i32
  }
  func.func @transform_1(%arg0: i32) -> (i32, i32) {
    %c0_i32 = arith.constant 0 : i32
    %c0_i32_0 = arith.constant 0 : i32
    %c0_i32_1 = arith.constant 0 : i32
    return %c0_i32, %c0_i32_0 : i32, i32
  }
  func.func @transform_2(%arg0: i32) -> (i32, i32) {
    %c0_i32 = arith.constant 0 : i32
    %c0_i32_0 = arith.constant 0 : i32
    %c0_i32_1 = arith.constant 0 : i32
    return %c0_i32, %c0_i32_0 : i32, i32
  }
  func.func @transform_3(%arg0: i32) -> (i32, i32) {
    %c0_i32 = arith.constant 0 : i32
    %c0_i32_0 = arith.constant 0 : i32
    %c0_i32_1 = arith.constant 0 : i32
    return %c0_i32, %c0_i32_0 : i32, i32
  }
  func.func @transform_4(%arg0: i32) -> (i32, i32) {
    %c0_i32 = arith.constant 0 : i32
    %c0_i32_0 = arith.constant 0 : i32
    %c0_i32_1 = arith.constant 0 : i32
    return %c0_i32, %c0_i32_0 : i32, i32
  }
  func.func @transform_5(%arg0: i32) -> (i32, i32) {
    %c0_i32 = arith.constant 0 : i32
    %c0_i32_0 = arith.constant 0 : i32
    %c0_i32_1 = arith.constant 0 : i32
    return %c0_i32, %c0_i32_0 : i32, i32
  }
  func.func @transform_6(%arg0: i32) -> (i32, i32) {
    %c0_i32 = arith.constant 0 : i32
    %c0_i32_0 = arith.constant 0 : i32
    %c0_i32_1 = arith.constant 0 : i32
    return %c0_i32, %c0_i32_0 : i32, i32
  }
  func.func @transform_7(%arg0: i32) -> (i32, i32) {
    %c0_i32 = arith.constant 0 : i32
    %c0_i32_0 = arith.constant 0 : i32
    %c0_i32_1 = arith.constant 0 : i32
    return %c0_i32, %c0_i32_0 : i32, i32
  }
  func.func @transform_8(%arg0: i32) -> (i32, i32) {
    %c0_i32 = arith.constant 0 : i32
    %c0_i32_0 = arith.constant 0 : i32
    %c0_i32_1 = arith.constant 0 : i32
    return %c0_i32, %c0_i32_0 : i32, i32
  }
  func.func @transform_9(%arg0: i32) -> (i32, i32) {
    %c0_i32 = arith.constant 0 : i32
    %c0_i32_0 = arith.constant 0 : i32
    %c0_i32_1 = arith.constant 0 : i32
    return %c0_i32, %c0_i32_0 : i32, i32
  }
}

</mosaic_0001>

<bundles_post_ra>
// kernel: tpu_custom_call.1
= control target key start
LH: loop header
LB: loop body
LE: loop exit
PB: predicated region body
PF: predicated region fallthrough
CT: control target
= control target key end

     0   :  { %14 = vsyncpa [#allocation4], 0  ;;  %s3857_s0 = inlined_call_operand.vmem [shape: f32[64,6], index: 0, kind: input, shape index: {}]   ;;  %s3858_s1 = inlined_call_operand.vmem [shape: f32[6,384], index: 1, kind: input, shape index: {}]   ;;  %s3859_s2 = inlined_call_operand.hbm [shape: f32[128,384], index: 2, kind: input, shape index: {}]   ;;  %s3860_s3 = inlined_call_operand.vmem [shape: f32[1,384], index: 3, kind: input, shape index: {}]   ;;  %s3861_s4 = inlined_call_operand.vmem [shape: f32[1,128], index: 4, kind: input, shape index: {}]   ;;  %s3862_s5 = inlined_call_operand.hbm [shape: f32[64,384], index: 5, kind: input, shape index: {}]   ;;  %s3863_s6 = inlined_call_operand.vmem [shape: f32[64,128], index: 6, kind: input, shape index: {}]   ;;  %s3864_s7 = inlined_call_operand.hbm [shape: f32[128,128], index: 7, kind: input, shape index: {}]   ;;  %s3865_s8 = inlined_call_operand.vmem [shape: f32[1,128], index: 8, kind: input, shape index: {}]   ;;  %s3866_s9 = inlined_call_operand.hbm [shape: f32[8,128], index: 9, kind: output, shape index: {}]  }
   0x1   :  { %15 = vsyncpa [#allocation7], 0 }
   0x2   :  { %16 = vsyncpa [#allocation5], 0  ;;  %s3153_s30 = smov [#allocation6]   ;;  %s3154_s11 = smov [#allocation3]  }
   0x3   :  { %s42_s10 = sshll.u32 %s3153_s30, 4  ;;  %s26_s12 = sshll.u32 %s3154_s11, 4  ;;  %s43_s10 = int_to_ptr.vmem [resolvable:$true] %s42_s10  ;;  %s3214_s12 = int_to_ptr.vmem [resolvable:$true] %s26_s12 }
   0x4   :  { %s3059_s15 = scalar_lea.hbm %s3862_s5, 3072 }
   0x5   :  { %p3060_p0 = scmp.ne.s32.totalorder %s3862_s5, %s3059_s15  ;;  %p3063_p1 = scmp.lt.u32.totalorder %s3059_s15, %s3862_s5 }
   0x7   :  { %p3065_p2 = pnand %p3063_p1, %p3060_p0 }
   0x9   :  { %3068 = shalt.err (!%p3065_p2)
}
   0xa   :  { %s3069_s20 = scalar_lea.vmem %s43_s10, 3072  ;;  %p3074_p4 = scmp.lt.s32.totalorder %s43_s10, %s43_s10 }
   0xb   :  { %p3070_p3 = scmp.ne.s32.totalorder %s43_s10, %s3069_s20  ;;  %p3075_p5 = scmp.lt.s32.totalorder %s3069_s20, %s3069_s20 }
   0xd   :  { %p3076_p6 = por %p3075_p5, %p3074_p4 }
   0xf   :  { %p3077_p7 = pnand %p3076_p6, %p3070_p3 }
  0x11   :  { %3080 = shalt.err (!%p3077_p7)
}
  0x12   :  { %s3155_s21 = smov 384   ;;  %s3156_s22 = smov 24  }
  0x13   :  { %48 = dma.hbm_to_vmem [thread:$0]  %s3862_s5, 3072, %s43_s10, [#allocation7], %s3155_s21, %s3155_s21, %s3156_s22  }
  0x14   :  { %s3081_s27 = scalar_lea.hbm %s3859_s2, 6144 }
  0x15   :  { %p3082_p8 = scmp.ne.s32.totalorder %s3859_s2, %s3081_s27  ;;  %p3085_p9 = scmp.lt.u32.totalorder %s3081_s27, %s3859_s2 }
  0x17   :  { %p3087_p10 = pnand %p3085_p9, %p3082_p8 }
  0x19   :  { %3090 = shalt.err (!%p3087_p10)
}
  0x1a   :  { %s3091_s13 = scalar_lea.vmem %s3214_s12, 6144  ;;  %p3096_p12 = scmp.lt.s32.totalorder %s3214_s12, %s3214_s12 }
  0x1b   :  { %p3092_p11 = scmp.ne.s32.totalorder %s3214_s12, %s3091_s13  ;;  %p3097_p13 = scmp.lt.s32.totalorder %s3091_s13, %s3091_s13 }
  0x1d   :  { %p3098_p0 = por %p3097_p13, %p3096_p12 }
  0x1f   :  { %p3099_p1 = pnand %p3098_p0, %p3092_p11 }
  0x21   :  { %3102 = shalt.err (!%p3099_p1)
}
  0x22   :  { %32 = dma.hbm_to_vmem [thread:$0]  %s3859_s2, 6144, %s3214_s12, [#allocation4], %s3155_s21, %s3155_s21, %s3156_s22  }
  0x23   :  { %s3157_s14 = smov [#allocation8]   ;;  %s3103_s18 = scalar_lea.hbm %s3864_s7, 2048 }
  0x24   :  { %s56_s15 = sshll.u32 %s3157_s14, 4  ;;  %p3104_p2 = scmp.ne.s32.totalorder %s3864_s7, %s3103_s18  ;;  %s57_s15 = int_to_ptr.vmem [resolvable:$true] %s56_s15 }
  0x25   :  { %p3107_p3 = scmp.lt.u32.totalorder %s3103_s18, %s3864_s7 }
  0x27   :  { %p3109_p4 = pnand %p3107_p3, %p3104_p2 }
  0x29   :  { %3112 = shalt.err (!%p3109_p4)
}
  0x2a   :  { %s3113_s25 = scalar_lea.vmem %s57_s15, 2048  ;;  %p3118_p6 = scmp.lt.s32.totalorder %s57_s15, %s57_s15 }
  0x2b   :  { %p3114_p5 = scmp.ne.s32.totalorder %s57_s15, %s3113_s25  ;;  %p3119_p7 = scmp.lt.s32.totalorder %s3113_s25, %s3113_s25 }
  0x2d   :  { %p3120_p8 = por %p3119_p7, %p3118_p6 }
  0x2f   :  { %p3121_p9 = pnand %p3120_p8, %p3114_p5 }
  0x31   :  { %3124 = shalt.err (!%p3121_p9)
}
  0x32   :  { %s3158_s2 = smov 128   ;;  %s3159_s12 = smov 8  }
  0x33   :  { %62 = dma.hbm_to_vmem [thread:$0]  %s3864_s7, 2048, %s57_s15, [#allocation7], %s3158_s2, %s3158_s2, %s3159_s12  }
  0x34   :  { %3147 = dma.done.wait [#allocation4], 6144  }
  0x35   :  { %3148 = vsyncadd [#allocation4], 4294961152 }
  0x36   :  { %3149 = dma.done.wait [#allocation7], 5120  }
  0x37   :  { %3150 = vsyncadd [#allocation7], 4294962176  ;;  %v3867_v0 = vmov 0.0   ;;  %vm110_vm0 = vcmask 1045504   ;;  %v83_v1 = vld [vmem:[%s3858_s1 + $0x8] sm:$0x3f] }
  0x38   :  { %184 = vmatprep.mubr.f32.mxu0 %v3867_v0  ;;  %v82_v2 = vld [vmem:[%s3858_s1] sm:$0x3f]  ;;  %vm85_vm1 = vcmask 48128   ;;  %1968 = vmatprep.subr.msk.mxu0 %vm110_vm0, %v83_v1  ;;  %v455_v5 = vld [vmem:[#allocation3 + $0x20] sm:$0xff]  ;;  %v454_v8 = vld [vmem:[#allocation3 + $0x18] sm:$0xff]  ;;  %v3869_v40 = vmov 0.0|0.0  }
  0x39   :  { %v74_v3 = vld [vmem:[%s3857_s0] sm:$0xff]  ;;  %v451_v6 = vld [vmem:[#allocation3] sm:$0xff]  ;;  %1969 = vmatpush1.msk.msra.mxu0 %vm110_vm0, %v82_v2  ;;  %v458_v9 = vld [vmem:[#allocation3 + $0x38] sm:$0xff]  ;;  %vm3162_vm2 = vmmov 0   ;;  %s3163_s19 = smov [#allocation9]  }
  0x3a   :  { %v452_v4 = vld [vmem:[#allocation3 + $0x8] sm:$0xff]  ;;  %2169 = vmatprep.mubr.msk.f32.mxu1 %vm85_vm1, %v74_v3  ;;  %1970 = vmatmul.mubr.msk.f32.vlgmr.msra.gmra.mrb[0].mxu0 %vm85_vm1, %v74_v3  ;;  %v3273_v10 = vpack.c.bf16 %v454_v8, %v451_v6  ;;  %v461_v11 = vld [vmem:[#allocation3 + $0x50] sm:$0xff]  ;;  %v467_v17 = vld [vmem:[#allocation3 + $0x80] sm:$0xff]  ;;  %s1958_s20 = sshll.u32 %s3163_s19, 4  ;;  %s1959_s20 = int_to_ptr.vmem [resolvable:$true] %s1958_s20 }
  0x3b   :  { %v3270_v7 = vpack.c.bf16 %v455_v5, %v452_v4  ;;  %v457_v12 = vld [vmem:[#allocation3 + $0x30] sm:$0xff]  ;;  %v460_v13 = vld [vmem:[#allocation3 + $0x48] sm:$0xff]  ;;  %190 = vmatprep.mubr.f32.mxu0 %v3867_v0  ;;  %v3280_v15 = vpack.c.bf16 %v461_v11, %v458_v9  ;;  %v463_v20 = vld [vmem:[#allocation3 + $0x60] sm:$0xff]  ;;  %s3125_s23 = scalar_lea.vmem %s1959_s20, 128  ;;  %p3130_p11 = scmp.lt.s32.totalorder %s1959_s20, %s1959_s20 }
  0x3c   :  { %v75_v14 = vld [vmem:[%s3857_s0 + $0x8] sm:$0xff]  ;;  %v464_v16 = vld [vmem:[#allocation3 + $0x68] sm:$0xff]  ;;  %v3283_v18 = vpack.c.bf16 %v460_v13, %v457_v12  ;;  %v466_v21 = vld [vmem:[#allocation3 + $0x78] sm:$0xff]  ;;  %p3126_p10 = scmp.ne.s32.totalorder %s1959_s20, %s3125_s23  ;;  %p3131_p12 = scmp.lt.s32.totalorder %s3125_s23, %s3125_s23 }
  0x3d   :  { %2497 = vmatprep.subr.bf16.mxu0 %v3270_v7  ;;  %v3286_v19 = vpack.c.bf16 %v467_v17, %v464_v16  ;;  %v470_v22 = vld [vmem:[#allocation3 + $0x98] sm:$0xff]  ;;  %v473_v23 = vld [vmem:[#allocation3 + $0xb0] sm:$0xff]  ;;  %v3294_v25 = vpack.c.bf16 %v466_v21, %v463_v20  ;;  %v472_v28 = vld [vmem:[#allocation3 + $0xa8] sm:$0xff] }
  0x3e   :  { %2499 = vmatpush1.bf16.msra.mxu0 %v3273_v10  ;;  %v76_v24 = vld [vmem:[%s3857_s0 + $0x10] sm:$0xff]  ;;  %v3297_v26 = vpack.c.bf16 %v473_v23, %v470_v22  ;;  %v469_v27 = vld [vmem:[#allocation3 + $0x90] sm:$0xff]  ;;  %v476_v29 = vld [vmem:[#allocation3 + $0xc8] sm:$0xff]  ;;  %p3132_p13 = por %p3131_p12, %p3130_p11 }
  0x3f   :  { %2501 = vmatprep.subr.bf16.mxu0 %v3280_v15  ;;  %1971 = vmatmul.mubr.msk.f32.gmra.mrb[2].mxu0 %vm85_vm1, %v75_v14  ;;  %v479_v30 = vld [vmem:[#allocation3 + $0xe0] sm:$0xff]  ;;  %v84_v31 = vld [vmem:[%s3858_s1 + $0x10] sm:$0x3f]  ;;  %v453_v33 = vld [vmem:[#allocation3 + $0x10] sm:$0xff]  ;;  %v3309_v34 = vpack.c.bf16 %v472_v28, %v469_v27 }
  0x40   :  { %196 = vmatprep.mubr.f32.mxu0 %v3867_v0  ;;  %v77_v32 = vld [vmem:[%s3857_s0 + $0x18] sm:$0xff]  ;;  %2167 = vmatprep.subr.msk.mxu1 %vm110_vm0, %v84_v31  ;;  %v456_v35 = vld [vmem:[#allocation3 + $0x28] sm:$0xff]  ;;  %v3313_v36 = vpack.c.bf16 %v479_v30, %v476_v29  ;;  %v478_v38 = vld [vmem:[#allocation3 + $0xd8] sm:$0xff]  ;;  %v388_v29 = vlaneseq  ;;  %p3133_p0 = pnand %p3132_p13, %p3126_p10 }
  0x41   :  { %2168 = vmatpush3.msk.msra.mxu1 %vm110_vm0, %v84_v31  ;;  %v475_v37 = vld [vmem:[#allocation3 + $0xc0] sm:$0xff]  ;;  %v482_v39 = vld [vmem:[#allocation3 + $0xf8] sm:$0xff]  ;;  %v3316_v41 = vpack.c.bf16 %v456_v35, %v453_v33  ;;  %v485_v42 = vld [vmem:[#allocation3 + $0x110] sm:$0xff] }
  0x42   :  { %2503 = vmatpush1.bf16.msra.mxu0 %v3283_v18  ;;  %2528 = vmatprep.subr.bf16.mxu1 %v3869_v40  ;;  %v459_v43 = vld [vmem:[#allocation3 + $0x40] sm:$0xff]  ;;  %v462_v44 = vld [vmem:[#allocation3 + $0x58] sm:$0xff]  ;;  %v78_v45 = vld [vmem:[%s3857_s0 + $0x20] sm:$0xff]  ;;  %v3328_v47 = vpack.c.bf16 %v478_v38, %v475_v37  ;;  %v3332_v50 = vpack.c.bf16 %v485_v42, %v482_v39  ;;  %v389_v30 = vshrl.u32 %v388_v29, 7 }
  0x43   :  { %2505 = vmatprep.subr.bf16.mxu0 %v3286_v19  ;;  %1972 = vmatmul.mubr.msk.f32.gmra.mrb[4].mxu0 %vm85_vm1, %v76_v24  ;;  %v3325_v46 = vpack.c.bf16 %v462_v44, %v459_v43  ;;  %v465_v48 = vld [vmem:[#allocation3 + $0x70] sm:$0xff]  ;;  %v468_v49 = vld [vmem:[#allocation3 + $0x88] sm:$0xff]  ;;  %v491_v54 = vld [vmem:[#allocation3 + $0x140] sm:$0xff] }
  0x44   :  { %202 = vmatprep.mubr.f32.mxu0 %v3867_v0  ;;  %2170 = vmatmul.mubr.msk.f32.vlgmr.msra.gmra.mrb[0].mxu1 %vm85_vm1, %v75_v14  ;;  %v481_v51 = vld [vmem:[#allocation3 + $0xf0] sm:$0xff]  ;;  %v484_v52 = vld [vmem:[#allocation3 + $0x108] sm:$0xff]  ;;  %v3342_v56 = vpack.c.bf16 %v468_v49, %v465_v48  ;;  %v471_v58 = vld [vmem:[#allocation3 + $0xa0] sm:$0xff]  ;;  %v390_v33 = vsub.s32 0, %v389_v30  ;;  %v394_v38 = vsub.s32 1, %v389_v30 }
  0x45   :  { %2530 = vmatpush3.bf16.msra.mxu1 %v3316_v41  ;;  %2172 = vmatprep.mubr.msk.f32.mxu1 %vm85_vm1, %v76_v24  ;;  %v488_v53 = vld [vmem:[#allocation3 + $0x128] sm:$0xff]  ;;  %v79_v55 = vld [vmem:[%s3857_s0 + $0x28] sm:$0xff]  ;;  %v3345_v57 = vpack.c.bf16 %v484_v52, %v481_v51  ;;  %v474_v59 = vld [vmem:[#allocation3 + $0xb8] sm:$0xff] }
  0x46   :  { %2507 = vmatpush1.bf16.msra.mxu0 %v3294_v25  ;;  %2531 = vmatprep.subr.bf16.mxu1 %v3869_v40  ;;  %v3349_v60 = vpack.c.bf16 %v491_v54, %v488_v53  ;;  %v487_v61 = vld [vmem:[#allocation3 + $0x120] sm:$0xff]  ;;  %v490_v62 = vld [vmem:[#allocation3 + $0x138] sm:$0xff]  ;;  %v497_v1 = vld [vmem:[#allocation3 + $0x170] sm:$0xff]  ;;  %v3359_v3 = vpack.c.bf16 %v474_v59, %v471_v58  ;;  %v398_v53 = vsub.s32 2, %v389_v30 }
  0x47   :  { %2509 = vmatprep.subr.bf16.mxu0 %v3297_v26  ;;  %1973 = vmatmul.mubr.msk.f32.gmra.mrb[6].mxu0 %vm85_vm1, %v77_v32  ;;  %v494_v63 = vld [vmem:[#allocation3 + $0x158] sm:$0xff]  ;;  %v3362_v4 = vpack.c.bf16 %v490_v62, %v487_v61  ;;  %v477_v5 = vld [vmem:[#allocation3 + $0xd0] sm:$0xff]  ;;  %v480_v6 = vld [vmem:[#allocation3 + $0xe8] sm:$0xff] }
  0x48   :  { %208 = vmatprep.mubr.f32.mxu0 %v3867_v0  ;;  %2173 = vmatmul.mubr.msk.f32.gmra.mrb[2].mxu1 %vm85_vm1, %v77_v32  ;;  %v80_v2 = vld [vmem:[%s3857_s0 + $0x30] sm:$0xff]  ;;  %v81_v8 = vld [vmem:[%s3857_s0 + $0x38] sm:$0xff]  ;;  %v3369_v9 = vpack.c.bf16 %v497_v1, %v494_v63  ;;  %v493_v11 = vld [vmem:[#allocation3 + $0x150] sm:$0xff]  ;;  %v3376_v13 = vpack.c.bf16 %v480_v6, %v477_v5 }
  0x49   :  { %2533 = vmatpush3.bf16.msra.mxu1 %v3325_v46  ;;  %2175 = vmatprep.mubr.msk.f32.mxu1 %vm85_vm1, %v78_v45  ;;  %v496_v12 = vld [vmem:[#allocation3 + $0x168] sm:$0xff]  ;;  %v483_v16 = vld [vmem:[#allocation3 + $0x100] sm:$0xff]  ;;  %v486_v17 = vld [vmem:[#allocation3 + $0x118] sm:$0xff] }
  0x4a   :  { %2511 = vmatpush1.bf16.msra.mxu0 %v3309_v34  ;;  %2534 = vmatprep.subr.bf16.mxu1 %v3869_v40  ;;  %v3379_v14 = vpack.c.bf16 %v496_v12, %v493_v11  ;;  %v3388_v20 = vpack.c.bf16 %v486_v17, %v483_v16  ;;  %v489_v21 = vld [vmem:[#allocation3 + $0x130] sm:$0xff]  ;;  %v492_v22 = vld [vmem:[#allocation3 + $0x148] sm:$0xff]  ;;  %v495_v24 = vld [vmem:[#allocation3 + $0x160] sm:$0xff] }
  0x4b   :  { %2513 = vmatprep.subr.bf16.mxu0 %v3313_v36  ;;  %1974 = vmatmul.mubr.msk.f32.gmra.mrb[8].mxu0 %vm85_vm1, %v78_v45  ;;  %v3395_v23 = vpack.c.bf16 %v492_v22, %v489_v21  ;;  %v498_v27 = vld [vmem:[#allocation3 + $0x178] sm:$0xff]  ;;  %v386_v37 = vld [vmem:[%s3860_s3] sm:$0x7]  ;;  %v342_v39 = vld [vmem:[#allocation6 + $0x20] sm:$0xff] }
  0x4c   :  { %214 = vmatprep.mubr.f32.mxu0 %v3867_v0  ;;  %2176 = vmatmul.mubr.msk.f32.gmra.mrb[4].mxu1 %vm85_vm1, %v79_v55  ;;  %v3402_v28 = vpack.c.bf16 %v498_v27, %v495_v24  ;;  %v341_v35 = vld [vmem:[#allocation6 + $0x18] sm:$0xff]  ;;  %v3447_v45 = vrot.slane %v386_v37, %v390_v33  ;;  %v344_v49 = vld [vmem:[#allocation6 + $0x30] sm:$0xff]  ;;  %v3449_v51 = vrot.slane %v386_v37, %v394_v38  ;;  %v347_v63 = vld [vmem:[#allocation6 + $0x48] sm:$0xff] }
  0x4d   :  { %2536 = vmatpush3.bf16.msra.mxu1 %v3342_v56  ;;  %2178 = vmatprep.mubr.msk.f32.mxu1 %vm85_vm1, %v80_v2  ;;  %v345_v52 = vld [vmem:[#allocation6 + $0x38] sm:$0xff]  ;;  %v343_v1 = vld [vmem:[#allocation6 + $0x28] sm:$0xff]  ;;  %v3457_v5 = vrot.slane %v386_v37, %v398_v53  ;;  %v350_v27 = vld [vmem:[#allocation6 + $0x60] sm:$0xff] }
  0x4e   :  { %2515 = vmatpush1.bf16.msra.mxu0 %v3328_v47  ;;  %2537 = vmatprep.subr.bf16.mxu1 %v3869_v40  ;;  %v349_v29 = vld [vmem:[#allocation6 + $0x58] sm:$0xff]  ;;  %v351_v30 = vld [vmem:[#allocation6 + $0x68] sm:$0xff] }
  0x4f   :  { %2517 = vmatprep.subr.bf16.mxu0 %v3332_v50  ;;  %1975 = vmatmul.mubr.msk.f32.gmra.mrb[10].mxu0 %vm85_vm1, %v79_v55  ;;  %v353_v53 = vld [vmem:[#allocation6 + $0x78] sm:$0xff] }
  0x50   :  { %220 = vmatprep.mubr.f32.mxu0 %v3867_v0  ;;  %2179 = vmatmul.mubr.msk.f32.gmra.mrb[6].mxu1 %vm85_vm1, %v81_v8 }
  0x51   :  { %2539 = vmatpush3.bf16.msra.mxu1 %v3359_v3  ;;  %2213 = vmatprep.mubr.msk.f32.mxu1 %vm3162_vm2, %v3867_v0 }
  0x52   :  { %2519 = vmatpush1.bf16.msra.mxu0 %v3345_v57  ;;  %2540 = vmatprep.subr.bf16.mxu1 %v3869_v40 }
  0x53   :  { %2521 = vmatprep.subr.bf16.mxu0 %v3349_v60  ;;  %1976 = vmatmul.mubr.msk.f32.gmra.mrb[12].mxu0 %vm85_vm1, %v80_v2  ;;  %v348_v2 = vld [vmem:[#allocation6 + $0x50] sm:$0xff] }
  0x54   :  { %226 = vmatprep.mubr.f32.mxu0 %v3867_v0 }
  0x55   :  { %2542 = vmatpush3.bf16.msra.mxu1 %v3376_v13 }
  0x56   :  { %2523 = vmatpush1.bf16.msra.mxu0 %v3362_v4  ;;  %2543 = vmatprep.subr.bf16.mxu1 %v3869_v40 }
  0x57   :  { %2525 = vmatprep.subr.bf16.mxu0 %v3369_v9  ;;  %1977 = vmatmul.mubr.msk.f32.gmra.mrb[14].mxu0 %vm85_vm1, %v81_v8 }
  0x58   :  { %564 = vmatprep.mubr.f32.mxu0 %v3867_v0 }
  0x59   :  { %2545 = vmatpush3.bf16.msra.mxu1 %v3388_v20 }
  0x5a   :  { %2527 = vmatpush1.bf16.msra.mxu0 %v3379_v14  ;;  %2546 = vmatprep.subr.bf16.mxu1 %v3869_v40 }
  0x5b   :  { %2553 = vmatprep.subr.bf16.mxu0 %v3270_v7 }
  0x5d   :  { %565 = vmatmul.mubr.f32.vlgmr.msra.gmra.mrb[16].mxu0 %v3867_v0  ;;  %2548 = vmatpush3.bf16.msra.mxu1 %v3395_v23 }
  0x5e   :  { %2555 = vmatpush1.bf16.msra.mxu0 %v3273_v10  ;;  %739 = vmatprep.mubr.f32.mxu0 %v3867_v0 }
  0x5f   :  { %2557 = vmatprep.subr.bf16.mxu0 %v3280_v15  ;;  %2549 = vmatprep.subr.bf16.mxu1 %v3869_v40 }
  0x61   :  { %2551 = vmatpush3.bf16.msra.mxu1 %v3402_v28 }
  0x62   :  { %2559 = vmatpush1.bf16.msra.mxu0 %v3283_v18  ;;  %2584 = vmatprep.subr.bf16.mxu1 %v3869_v40 }
  0x63   :  { %2561 = vmatprep.subr.bf16.mxu0 %v3286_v19 }
  0x64   :  { %2214 = vmatmul.mubr.f32.vlgmr.msra.gmra.mrb[8].mxu1 %v3867_v0 }
  0x65   :  { %2586 = vmatpush3.bf16.msra.mxu1 %v3316_v41  ;;  %2248 = vmatprep.mubr.msk.f32.mxu1 %vm3162_vm2, %v3867_v0 }
  0x66   :  { %2563 = vmatpush1.bf16.msra.mxu0 %v3294_v25  ;;  %2587 = vmatprep.subr.bf16.mxu1 %v3869_v40 }
  0x67   :  { %2565 = vmatprep.subr.bf16.mxu0 %v3297_v26 }
  0x69   :  { %2589 = vmatpush3.bf16.msra.mxu1 %v3325_v46 }
  0x6a   :  { %2567 = vmatpush1.bf16.msra.mxu0 %v3309_v34  ;;  %2590 = vmatprep.subr.bf16.mxu1 %v3869_v40 }
  0x6b   :  { %2569 = vmatprep.subr.bf16.mxu0 %v3313_v36 }
  0x6d   :  { %2592 = vmatpush3.bf16.msra.mxu1 %v3342_v56 }
  0x6e   :  { %2571 = vmatpush1.bf16.msra.mxu0 %v3328_v47  ;;  %2593 = vmatprep.subr.bf16.mxu1 %v3869_v40 }
  0x6f   :  { %2573 = vmatprep.subr.bf16.mxu0 %v3332_v50 }
  0x71   :  { %2595 = vmatpush3.bf16.msra.mxu1 %v3359_v3 }
  0x72   :  { %2575 = vmatpush1.bf16.msra.mxu0 %v3345_v57  ;;  %2596 = vmatprep.subr.bf16.mxu1 %v3869_v40 }
  0x73   :  { %2577 = vmatprep.subr.bf16.mxu0 %v3349_v60 }
  0x75   :  { %2598 = vmatpush3.bf16.msra.mxu1 %v3376_v13 }
  0x76   :  { %2579 = vmatpush1.bf16.msra.mxu0 %v3362_v4  ;;  %2599 = vmatprep.subr.bf16.mxu1 %v3869_v40 }
  0x77   :  { %2581 = vmatprep.subr.bf16.mxu0 %v3369_v9 }
  0x79   :  { %2601 = vmatpush3.bf16.msra.mxu1 %v3388_v20 }
  0x7a   :  { %2583 = vmatpush1.bf16.msra.mxu0 %v3379_v14  ;;  %2602 = vmatprep.subr.bf16.mxu1 %v3869_v40 }
  0x7b   :  { %2609 = vmatprep.subr.bf16.mxu0 %v3270_v7 }
  0x7d   :  { %2604 = vmatpush3.bf16.msra.mxu1 %v3395_v23 }
  0x7e   :  { %2605 = vmatprep.subr.bf16.mxu1 %v3869_v40 }
  0x81   :  { %2607 = vmatpush3.bf16.msra.mxu1 %v3402_v28 }
  0x82   :  { %2640 = vmatprep.subr.bf16.mxu1 %v3869_v40  ;;  %v360_v40 = vld [vmem:[#allocation6 + $0xb0] sm:$0xff] }
 0x10d   :  { %v3440_v31 = vpop.f32.mrb[0].mxu0 }
 0x10e   :  { %v3442_v32 = vpop.f32.mrb[1].mxu0 }
 0x112   :  { %v192_v42 = vpop.f32.mrb[2].mxu0 }
 0x113   :  { %v365_v43 = vmul.f32 %v341_v35, %v192_v42  ;;  %v194_v44 = vpop.f32.mrb[3].mxu0  ;;  %v346_v35 = vld [vmem:[#allocation6 + $0x40] sm:$0xff] }
 0x114   :  { %v366_v48 = vmul.f32 %v342_v39, %v194_v44 }
 0x115   :  { %v3452_v54 = vadd.f32 %v3447_v45, %v365_v43 }
 0x116   :  { %v198_v55 = vpop.f32.mrb[4].mxu0  ;;  %v3455_v58 = vadd.f32 %v3449_v51, %v366_v48 }
 0x117   :  { %v368_v59 = vmul.f32 %v344_v49, %v198_v55  ;;  %v200_v61 = vpop.f32.mrb[5].mxu0  ;;  %v2171_v11 = vpop.f32.mrb[0].mxu1 }
 0x118   :  { %v369_v62 = vmul.f32 %v345_v52, %v200_v61  ;;  %v367_v21 = vmul.f32 %v2171_v11, %v343_v1  ;;  %v3465_v22 = vpop.f32.mrb[1].mxu1  ;;  %v354_v61 = vld [vmem:[#allocation6 + $0x80] sm:$0xff] }
 0x119   :  { %v3460_v6 = vadd.f32 %v3447_v45, %v368_v59  ;;  %v355_v59 = vld [vmem:[#allocation6 + $0x88] sm:$0xff] }
 0x11a   :  { %v204_v8 = vpop.f32.mrb[6].mxu0  ;;  %v3463_v12 = vadd.f32 %v3449_v51, %v369_v62  ;;  %v3468_v33 = vadd.f32 %v3457_v5, %v367_v21 }
 0x11b   :  { %v371_v16 = vmul.f32 %v347_v63, %v204_v8  ;;  %v206_v17 = vpop.f32.mrb[7].mxu0  ;;  %v2174_v39 = vpop.f32.mrb[2].mxu1  ;;  %v352_v63 = vld [vmem:[#allocation6 + $0x70] sm:$0xff] }
 0x11c   :  { %v372_v24 = vmul.f32 %v348_v2, %v206_v17  ;;  %v373_v48 = vmul.f32 %v2174_v39, %v349_v29  ;;  %v309_v49 = vpop.f32.mrb[3].mxu1  ;;  %v357_v39 = vld [vmem:[#allocation6 + $0x98] sm:$0xff] }
 0x11d   :  { %v3471_v37 = vadd.f32 %v3447_v45, %v371_v16  ;;  %v370_v55 = vmul.f32 %v346_v35, %v309_v49 }
 0x11e   :  { %v210_v38 = vpop.f32.mrb[8].mxu0  ;;  %v3474_v42 = vadd.f32 %v3449_v51, %v372_v24  ;;  %v3477_v62 = vadd.f32 %v3457_v5, %v373_v48 }
 0x11f   :  { %v374_v43 = vmul.f32 %v350_v27, %v210_v38  ;;  %v212_v44 = vpop.f32.mrb[9].mxu0  ;;  %v3483_v8 = vadd.f32 %v3457_v5, %v370_v55  ;;  %v2177_v11 = vpop.f32.mrb[4].mxu1  ;;  %v361_v38 = vld [vmem:[#allocation6 + $0xb8] sm:$0xff] }
 0x120   :  { %v375_v52 = vmul.f32 %v351_v30, %v212_v44  ;;  %v379_v24 = vmul.f32 %v2177_v11, %v355_v59  ;;  %v319_v27 = vpop.f32.mrb[5].mxu1  ;;  %v356_v30 = vld [vmem:[#allocation6 + $0x90] sm:$0xff]  ;;  %v358_v44 = vld [vmem:[#allocation6 + $0xa0] sm:$0xff] }
 0x121   :  { %v3480_v1 = vadd.f32 %v3447_v45, %v374_v43  ;;  %v376_v35 = vmul.f32 %v352_v63, %v319_v27  ;;  %v338_v59 = vld [vmem:[#allocation6] sm:$0xff]  ;;  %v359_v27 = vld [vmem:[#allocation6 + $0xa8] sm:$0xff] }
 0x122   :  { %v216_v2 = vpop.f32.mrb[10].mxu0  ;;  %v3486_v16 = vadd.f32 %v3449_v51, %v375_v52  ;;  %v3489_v43 = vadd.f32 %v3457_v5, %v379_v24 }
 0x123   :  { %v377_v17 = vmul.f32 %v353_v53, %v216_v2  ;;  %v218_v21 = vpop.f32.mrb[11].mxu0  ;;  %v3495_v52 = vadd.f32 %v3457_v5, %v376_v35  ;;  %v2180_v53 = vpop.f32.mrb[6].mxu1 }
 0x124   :  { %v378_v29 = vmul.f32 %v354_v61, %v218_v21  ;;  %3871 = vst [vmem:[#allocation13_spill] sm:$0xff] %v3489_v43  ;;  %v385_v2 = vmul.f32 %v2180_v53, %v361_v38  ;;  %v329_v11 = vpop.f32.mrb[7].mxu1  ;;  %v339_v21 = vld [vmem:[#allocation6 + $0x8] sm:$0xff]  ;;  %v362_v43 = vmul.f32 %v338_v59, %v3440_v31 }
 0x125   :  { %v3492_v48 = vadd.f32 %v3447_v45, %v377_v17  ;;  %v382_v0 = vmul.f32 %v358_v44, %v329_v11  ;;  %v363_v38 = vmul.f32 %v339_v21, %v3442_v32 }
 0x126   :  { %v222_v49 = vpop.f32.mrb[12].mxu0  ;;  %v3498_v55 = vadd.f32 %v3449_v51, %v378_v29  ;;  %v3501_v17 = vadd.f32 %v3457_v5, %v385_v2 }
 0x127   :  { %v380_v61 = vmul.f32 %v356_v30, %v222_v49  ;;  %v224_v63 = vpop.f32.mrb[13].mxu0 }
 0x128   :  { %3872 = vst [vmem:[#allocation14_spill] sm:$0xff] %v3498_v55  ;;  %v381_v24 = vmul.f32 %v357_v39, %v224_v63  ;;  %v3508_v55 = vadd.f32 %v3457_v5, %v382_v0  ;;  %v404_v0 = vadd.f32 %v3449_v51, %v363_v38 }
 0x129   :  { %v3504_v35 = vadd.f32 %v3447_v45, %v380_v61  ;;  %v403_v61 = vadd.f32 %v3447_v45, %v362_v43  ;;  %v3525_v43 = vld [vmem:[%s3861_s4] ss:$0 sm:$0xff] }
 0x12a   :  { %v228_v29 = vpop.f32.mrb[14].mxu0  ;;  %v3511_v30 = vadd.f32 %v3449_v51, %v381_v24 }
 0x12b   :  { %v383_v39 = vmul.f32 %v359_v27, %v228_v29  ;;  %v230_v44 = vpop.f32.mrb[15].mxu0 }
 0x12c   :  { %v384_v49 = vmul.f32 %v360_v40, %v230_v44 }
 0x12d   :  { %v3515_v53 = vadd.f32 %v3447_v45, %v383_v39  ;;  %v340_v45 = vld [vmem:[#allocation6 + $0x10] sm:$0xff] }
 0x12e   :  { %v3519_v63 = vadd.f32 %v3449_v51, %v384_v49  ;;  %v364_v51 = vmul.f32 %v340_v45, %v3465_v22  ;;  %v3874_v22 = vmov 0.0  }
 0x130   :  { %v566_v31 = vpop.f32.mrb[16].mxu0 }
 0x131   :  { %v644_v59 = vadd.f32 %v566_v31, %v403_v61  ;;  %v568_v2 = vpop.f32.mrb[17].mxu0  ;;  %v405_v61 = vadd.f32 %v3457_v5, %v364_v51  ;;  %v3873_v5 = vmov 0.0|0.0  }
 0x132   :  { %v651_v11 = vadd.f32 %v568_v2, %v404_v0 }
 0x133   :  { %v1987_v24 = vmul.f32 -1.442695, %v644_v59 }
 0x134   :  { %v1988_v32 = vmul.f32 -1.442695, %v651_v11 }
 0x135   :  { %2979 = vpow2.f32 %v1987_v24 }
 0x136   :  { %2981 = vpow2.f32 %v1988_v32 }
 0x137   :  { %v637_v21 = vpop.f32.mrb[8].mxu1 }
 0x138   :  { %v2215_v40 = vpop.f32.mrb[9].mxu1  ;;  %v664_v44 = vadd.f32 %v3525_v43, %v637_v21 }
 0x13f   :  { %v2980_v27 = vpop.eup %2979 }
 0x140   :  { %v648_v29 = vadd.f32 1.0, %v2980_v27  ;;  %v2982_v39 = vpop.eup %2981 }
 0x141   :  { %v655_v38 = vadd.f32 1.0, %v2982_v39 }
 0x142   :  { %2983 = vrcp.f32 %v648_v29 }
 0x143   :  { %2985 = vrcp.f32 %v655_v38 }
 0x14c   :  { %v2984_v49 = vpop.eup %2983 }
 0x14d   :  { %v665_v31 = vmul.f32 %v2984_v49, %v664_v44  ;;  %v2986_v59 = vpop.eup %2985 }
 0x14e   :  { %v668_v2 = vsub.f32 1.0, %v2986_v59  ;;  %v670_v32 = vmul.f32 0.0, %v2986_v59 }
 0x14f   :  { %v666_v0 = vadd.f32 %v665_v31, %v405_v61 }
 0x151   :  { %2987 = vtanh.f32 %v666_v0 }
 0x15b   :  { %v2988_v11 = vpop.eup %2987 }
 0x15c   :  { %v669_v24 = vmul.f32 %v2988_v11, %v668_v2 }
 0x15e   :  { %v3530_v40 = vadd.f32 %v670_v32, %v669_v24 }
 0x160   :  { %740 = vmatmul.mubr.f32.vlgmr.msra.gmra.mrb[18].mxu0 %v3530_v40  ;;  %2249 = vmatmul.mubr.f32.vlgmr.msra.gmra.mrb[10].mxu1 %v3530_v40 }
 0x161   :  { %2611 = vmatpush1.bf16.msra.mxu0 %v3273_v10  ;;  %2642 = vmatpush3.bf16.msra.mxu1 %v3316_v41 }
 0x162   :  { %2613 = vmatprep.subr.bf16.mxu0 %v3280_v15  ;;  %2643 = vmatprep.subr.bf16.mxu1 %v3873_v5 }
 0x163   :  { %908 = vmatprep.mubr.f32.mxu0 %v3874_v22  ;;  %2283 = vmatprep.mubr.msk.f32.mxu1 %vm3162_vm2, %v3874_v22 }
 0x165   :  { %2615 = vmatpush1.bf16.msra.mxu0 %v3283_v18  ;;  %2645 = vmatpush3.bf16.msra.mxu1 %v3325_v46 }
 0x166   :  { %2617 = vmatprep.subr.bf16.mxu0 %v3286_v19  ;;  %2646 = vmatprep.subr.bf16.mxu1 %v3873_v5 }
 0x169   :  { %2619 = vmatpush1.bf16.msra.mxu0 %v3294_v25  ;;  %2648 = vmatpush3.bf16.msra.mxu1 %v3342_v56 }
 0x16a   :  { %2621 = vmatprep.subr.bf16.mxu0 %v3297_v26  ;;  %2649 = vmatprep.subr.bf16.mxu1 %v3873_v5 }
 0x16d   :  { %2623 = vmatpush1.bf16.msra.mxu0 %v3309_v34  ;;  %2651 = vmatpush3.bf16.msra.mxu1 %v3359_v3 }
 0x16e   :  { %2625 = vmatprep.subr.bf16.mxu0 %v3313_v36  ;;  %2652 = vmatprep.subr.bf16.mxu1 %v3873_v5 }
 0x171   :  { %2627 = vmatpush1.bf16.msra.mxu0 %v3328_v47  ;;  %2654 = vmatpush3.bf16.msra.mxu1 %v3376_v13 }
 0x172   :  { %2629 = vmatprep.subr.bf16.mxu0 %v3332_v50  ;;  %2655 = vmatprep.subr.bf16.mxu1 %v3873_v5 }
 0x175   :  { %2631 = vmatpush1.bf16.msra.mxu0 %v3345_v57  ;;  %2657 = vmatpush3.bf16.msra.mxu1 %v3388_v20 }
 0x176   :  { %2633 = vmatprep.subr.bf16.mxu0 %v3349_v60  ;;  %2658 = vmatprep.subr.bf16.mxu1 %v3873_v5 }
 0x179   :  { %2635 = vmatpush1.bf16.msra.mxu0 %v3362_v4  ;;  %2660 = vmatpush3.bf16.msra.mxu1 %v3395_v23 }
 0x17a   :  { %2637 = vmatprep.subr.bf16.mxu0 %v3369_v9  ;;  %2661 = vmatprep.subr.bf16.mxu1 %v3873_v5 }
 0x17d   :  { %2639 = vmatpush1.bf16.msra.mxu0 %v3379_v14  ;;  %2663 = vmatpush3.bf16.msra.mxu1 %v3402_v28 }
 0x17e   :  { %2665 = vmatprep.subr.bf16.mxu0 %v3270_v7  ;;  %2696 = vmatprep.subr.bf16.mxu1 %v3873_v5 }
 0x233   :  { %v741_v21 = vpop.f32.mrb[18].mxu0  ;;  %v812_v27 = vpop.f32.mrb[10].mxu1 }
 0x234   :  { %v819_v29 = vadd.f32 %v741_v21, %v3452_v54  ;;  %v743_v39 = vpop.f32.mrb[19].mxu0  ;;  %v2250_v45 = vpop.f32.mrb[11].mxu1  ;;  %v833_v59 = vadd.f32 %v3525_v43, %v812_v27 }
 0x235   :  { %v826_v51 = vadd.f32 %v743_v39, %v3455_v58 }
 0x236   :  { %v1990_v38 = vmul.f32 -1.442695, %v819_v29 }
 0x237   :  { %v1991_v44 = vmul.f32 -1.442695, %v826_v51 }
 0x238   :  { %2989 = vpow2.f32 %v1990_v38 }
 0x239   :  { %2991 = vpow2.f32 %v1991_v44 }
 0x242   :  { %v2990_v49 = vpop.eup %2989 }
 0x243   :  { %v823_v61 = vadd.f32 1.0, %v2990_v49  ;;  %v2992_v31 = vpop.eup %2991 }
 0x244   :  { %v830_v0 = vadd.f32 1.0, %v2992_v31 }
 0x245   :  { %2993 = vrcp.f32 %v823_v61 }
 0x246   :  { %2995 = vrcp.f32 %v830_v0 }
 0x24f   :  { %v2994_v2 = vpop.eup %2993 }
 0x250   :  { %v834_v11 = vmul.f32 %v2994_v2, %v833_v59  ;;  %v2996_v24 = vpop.eup %2995 }
 0x251   :  { %v837_v32 = vsub.f32 1.0, %v2996_v24  ;;  %v839_v29 = vmul.f32 %v2996_v24, %v3530_v40 }
 0x252   :  { %v835_v54 = vadd.f32 %v834_v11, %v3468_v33 }
 0x254   :  { %2997 = vtanh.f32 %v835_v54 }
 0x25e   :  { %v2998_v58 = vpop.eup %2997 }
 0x25f   :  { %v838_v21 = vmul.f32 %v2998_v58, %v837_v32 }
 0x261   :  { %v3574_v39 = vadd.f32 %v839_v29, %v838_v21 }
 0x263   :  { %909 = vmatmul.mubr.f32.vlgmr.msra.gmra.mrb[20].mxu0 %v3574_v39  ;;  %2284 = vmatmul.mubr.f32.vlgmr.msra.gmra.mrb[12].mxu1 %v3574_v39 }
 0x264   :  { %2667 = vmatpush1.bf16.msra.mxu0 %v3273_v10  ;;  %2698 = vmatpush3.bf16.msra.mxu1 %v3316_v41 }
 0x265   :  { %2669 = vmatprep.subr.bf16.mxu0 %v3280_v15  ;;  %2699 = vmatprep.subr.bf16.mxu1 %v3873_v5 }
 0x266   :  { %1077 = vmatprep.mubr.f32.mxu0 %v3874_v22  ;;  %2318 = vmatprep.mubr.msk.f32.mxu1 %vm3162_vm2, %v3874_v22 }
 0x268   :  { %2671 = vmatpush1.bf16.msra.mxu0 %v3283_v18  ;;  %2701 = vmatpush3.bf16.msra.mxu1 %v3325_v46 }
 0x269   :  { %2673 = vmatprep.subr.bf16.mxu0 %v3286_v19  ;;  %2702 = vmatprep.subr.bf16.mxu1 %v3873_v5 }
 0x26c   :  { %2675 = vmatpush1.bf16.msra.mxu0 %v3294_v25  ;;  %2704 = vmatpush3.bf16.msra.mxu1 %v3342_v56 }
 0x26d   :  { %2677 = vmatprep.subr.bf16.mxu0 %v3297_v26  ;;  %2705 = vmatprep.subr.bf16.mxu1 %v3873_v5 }
 0x270   :  { %2679 = vmatpush1.bf16.msra.mxu0 %v3309_v34  ;;  %2707 = vmatpush3.bf16.msra.mxu1 %v3359_v3 }
 0x271   :  { %2681 = vmatprep.subr.bf16.mxu0 %v3313_v36  ;;  %2708 = vmatprep.subr.bf16.mxu1 %v3873_v5 }
 0x274   :  { %2683 = vmatpush1.bf16.msra.mxu0 %v3328_v47  ;;  %2710 = vmatpush3.bf16.msra.mxu1 %v3376_v13 }
 0x275   :  { %2685 = vmatprep.subr.bf16.mxu0 %v3332_v50  ;;  %2711 = vmatprep.subr.bf16.mxu1 %v3873_v5 }
 0x278   :  { %2687 = vmatpush1.bf16.msra.mxu0 %v3345_v57  ;;  %2713 = vmatpush3.bf16.msra.mxu1 %v3388_v20 }
 0x279   :  { %2689 = vmatprep.subr.bf16.mxu0 %v3349_v60  ;;  %2714 = vmatprep.subr.bf16.mxu1 %v3873_v5 }
 0x27c   :  { %2691 = vmatpush1.bf16.msra.mxu0 %v3362_v4  ;;  %2716 = vmatpush3.bf16.msra.mxu1 %v3395_v23 }
 0x27d   :  { %2693 = vmatprep.subr.bf16.mxu0 %v3369_v9  ;;  %2717 = vmatprep.subr.bf16.mxu1 %v3873_v5 }
 0x280   :  { %2695 = vmatpush1.bf16.msra.mxu0 %v3379_v14  ;;  %2719 = vmatpush3.bf16.msra.mxu1 %v3402_v28 }
 0x281   :  { %2721 = vmatprep.subr.bf16.mxu0 %v3270_v7  ;;  %2752 = vmatprep.subr.bf16.mxu1 %v3873_v5 }
 0x336   :  { %v910_v33 = vpop.f32.mrb[20].mxu0  ;;  %v981_v27 = vpop.f32.mrb[12].mxu1 }
 0x337   :  { %v988_v45 = vadd.f32 %v910_v33, %v3460_v6  ;;  %v912_v51 = vpop.f32.mrb[21].mxu0  ;;  %v2285_v38 = vpop.f32.mrb[13].mxu1  ;;  %v1002_v11 = vadd.f32 %v3525_v43, %v981_v27 }
 0x338   :  { %v995_v44 = vadd.f32 %v912_v51, %v3463_v12 }
 0x339   :  { %v1992_v49 = vmul.f32 -1.442695, %v988_v45 }
 0x33a   :  { %v1993_v61 = vmul.f32 -1.442695, %v995_v44 }
 0x33b   :  { %2999 = vpow2.f32 %v1992_v49 }
 0x33c   :  { %3001 = vpow2.f32 %v1993_v61 }
 0x345   :  { %v3000_v31 = vpop.eup %2999 }
 0x346   :  { %v992_v0 = vadd.f32 1.0, %v3000_v31  ;;  %v3002_v59 = vpop.eup %3001 }
 0x347   :  { %v999_v2 = vadd.f32 1.0, %v3002_v59 }
 0x348   :  { %3003 = vrcp.f32 %v992_v0 }
 0x349   :  { %3005 = vrcp.f32 %v999_v2 }
 0x352   :  { %v3004_v54 = vpop.eup %3003 }
 0x353   :  { %v1003_v24 = vmul.f32 %v3004_v54, %v1002_v11  ;;  %v3006_v32 = vpop.eup %3005 }
 0x354   :  { %v1006_v58 = vsub.f32 1.0, %v3006_v32  ;;  %v1008_v29 = vmul.f32 %v3006_v32, %v3574_v39 }
 0x355   :  { %v1004_v6 = vadd.f32 %v1003_v24, %v3483_v8 }
 0x357   :  { %3007 = vtanh.f32 %v1004_v6 }
 0x361   :  { %v3008_v12 = vpop.eup %3007 }
 0x362   :  { %v1007_v21 = vmul.f32 %v3008_v12, %v1006_v58 }
 0x364   :  { %v3618_v33 = vadd.f32 %v1008_v29, %v1007_v21 }
 0x366   :  { %1078 = vmatmul.mubr.f32.vlgmr.msra.gmra.mrb[22].mxu0 %v3618_v33  ;;  %2319 = vmatmul.mubr.f32.vlgmr.msra.gmra.mrb[14].mxu1 %v3618_v33 }
 0x367   :  { %2723 = vmatpush1.bf16.msra.mxu0 %v3273_v10  ;;  %2754 = vmatpush3.bf16.msra.mxu1 %v3316_v41 }
 0x368   :  { %2725 = vmatprep.subr.bf16.mxu0 %v3280_v15  ;;  %2755 = vmatprep.subr.bf16.mxu1 %v3873_v5 }
 0x369   :  { %1246 = vmatprep.mubr.f32.mxu0 %v3874_v22  ;;  %2353 = vmatprep.mubr.msk.f32.mxu1 %vm3162_vm2, %v3874_v22 }
 0x36b   :  { %2727 = vmatpush1.bf16.msra.mxu0 %v3283_v18  ;;  %2757 = vmatpush3.bf16.msra.mxu1 %v3325_v46 }
 0x36c   :  { %2729 = vmatprep.subr.bf16.mxu0 %v3286_v19  ;;  %2758 = vmatprep.subr.bf16.mxu1 %v3873_v5 }
 0x36f   :  { %2731 = vmatpush1.bf16.msra.mxu0 %v3294_v25  ;;  %2760 = vmatpush3.bf16.msra.mxu1 %v3342_v56 }
 0x370   :  { %2733 = vmatprep.subr.bf16.mxu0 %v3297_v26  ;;  %2761 = vmatprep.subr.bf16.mxu1 %v3873_v5 }
 0x373   :  { %2735 = vmatpush1.bf16.msra.mxu0 %v3309_v34  ;;  %2763 = vmatpush3.bf16.msra.mxu1 %v3359_v3 }
 0x374   :  { %2737 = vmatprep.subr.bf16.mxu0 %v3313_v36  ;;  %2764 = vmatprep.subr.bf16.mxu1 %v3873_v5 }
 0x377   :  { %2739 = vmatpush1.bf16.msra.mxu0 %v3328_v47  ;;  %2766 = vmatpush3.bf16.msra.mxu1 %v3376_v13 }
 0x378   :  { %2741 = vmatprep.subr.bf16.mxu0 %v3332_v50  ;;  %2767 = vmatprep.subr.bf16.mxu1 %v3873_v5 }
 0x37b   :  { %2743 = vmatpush1.bf16.msra.mxu0 %v3345_v57  ;;  %2769 = vmatpush3.bf16.msra.mxu1 %v3388_v20 }
 0x37c   :  { %2745 = vmatprep.subr.bf16.mxu0 %v3349_v60  ;;  %2770 = vmatprep.subr.bf16.mxu1 %v3873_v5 }
 0x37f   :  { %2747 = vmatpush1.bf16.msra.mxu0 %v3362_v4  ;;  %2772 = vmatpush3.bf16.msra.mxu1 %v3395_v23 }
 0x380   :  { %2749 = vmatprep.subr.bf16.mxu0 %v3369_v9  ;;  %2773 = vmatprep.subr.bf16.mxu1 %v3873_v5 }
 0x383   :  { %2751 = vmatpush1.bf16.msra.mxu0 %v3379_v14  ;;  %2775 = vmatpush3.bf16.msra.mxu1 %v3402_v28 }
 0x384   :  { %2777 = vmatprep.subr.bf16.mxu0 %v3270_v7  ;;  %2808 = vmatprep.subr.bf16.mxu1 %v3873_v5 }
 0x439   :  { %v1079_v8 = vpop.f32.mrb[22].mxu0  ;;  %v1150_v27 = vpop.f32.mrb[14].mxu1 }
 0x43a   :  { %v1157_v45 = vadd.f32 %v1079_v8, %v3471_v37  ;;  %v1081_v51 = vpop.f32.mrb[23].mxu0  ;;  %v2320_v38 = vpop.f32.mrb[15].mxu1  ;;  %v1171_v11 = vadd.f32 %v3525_v43, %v1150_v27 }
 0x43b   :  { %v1164_v44 = vadd.f32 %v1081_v51, %v3474_v42 }
 0x43c   :  { %v1994_v49 = vmul.f32 -1.442695, %v1157_v45 }
 0x43d   :  { %v1995_v61 = vmul.f32 -1.442695, %v1164_v44 }
 0x43e   :  { %3009 = vpow2.f32 %v1994_v49 }
 0x43f   :  { %3011 = vpow2.f32 %v1995_v61 }
 0x448   :  { %v3010_v31 = vpop.eup %3009 }
 0x449   :  { %v1161_v0 = vadd.f32 1.0, %v3010_v31  ;;  %v3012_v59 = vpop.eup %3011 }
 0x44a   :  { %v1168_v2 = vadd.f32 1.0, %v3012_v59 }
 0x44b   :  { %3013 = vrcp.f32 %v1161_v0 }
 0x44c   :  { %3015 = vrcp.f32 %v1168_v2 }
 0x455   :  { %v3014_v54 = vpop.eup %3013 }
 0x456   :  { %v1172_v24 = vmul.f32 %v3014_v54, %v1171_v11  ;;  %v3016_v6 = vpop.eup %3015 }
 0x457   :  { %v1175_v32 = vsub.f32 1.0, %v3016_v6  ;;  %v1177_v12 = vmul.f32 %v3016_v6, %v3618_v33 }
 0x458   :  { %v1173_v37 = vadd.f32 %v1172_v24, %v3477_v62 }
 0x45a   :  { %3017 = vtanh.f32 %v1173_v37 }
 0x464   :  { %v3018_v42 = vpop.eup %3017 }
 0x465   :  { %v1176_v58 = vmul.f32 %v3018_v42, %v1175_v32 }
 0x467   :  { %v3662_v21 = vadd.f32 %v1177_v12, %v1176_v58 }
 0x469   :  { %1247 = vmatmul.mubr.f32.vlgmr.msra.gmra.mrb[24].mxu0 %v3662_v21  ;;  %2354 = vmatmul.mubr.f32.vlgmr.msra.gmra.mrb[16].mxu1 %v3662_v21 }
 0x46a   :  { %2779 = vmatpush1.bf16.msra.mxu0 %v3273_v10  ;;  %2810 = vmatpush3.bf16.msra.mxu1 %v3316_v41 }
 0x46b   :  { %2781 = vmatprep.subr.bf16.mxu0 %v3280_v15  ;;  %2811 = vmatprep.subr.bf16.mxu1 %v3873_v5 }
 0x46c   :  { %1415 = vmatprep.mubr.f32.mxu0 %v3874_v22  ;;  %2388 = vmatprep.mubr.msk.f32.mxu1 %vm3162_vm2, %v3874_v22 }
 0x46e   :  { %2783 = vmatpush1.bf16.msra.mxu0 %v3283_v18  ;;  %2813 = vmatpush3.bf16.msra.mxu1 %v3325_v46 }
 0x46f   :  { %2785 = vmatprep.subr.bf16.mxu0 %v3286_v19  ;;  %2814 = vmatprep.subr.bf16.mxu1 %v3873_v5 }
 0x472   :  { %2787 = vmatpush1.bf16.msra.mxu0 %v3294_v25  ;;  %2816 = vmatpush3.bf16.msra.mxu1 %v3342_v56 }
 0x473   :  { %2789 = vmatprep.subr.bf16.mxu0 %v3297_v26  ;;  %2817 = vmatprep.subr.bf16.mxu1 %v3873_v5 }
 0x476   :  { %2791 = vmatpush1.bf16.msra.mxu0 %v3309_v34  ;;  %2819 = vmatpush3.bf16.msra.mxu1 %v3359_v3 }
 0x477   :  { %2793 = vmatprep.subr.bf16.mxu0 %v3313_v36  ;;  %2820 = vmatprep.subr.bf16.mxu1 %v3873_v5 }
 0x47a   :  { %2795 = vmatpush1.bf16.msra.mxu0 %v3328_v47  ;;  %2822 = vmatpush3.bf16.msra.mxu1 %v3376_v13 }
 0x47b   :  { %2797 = vmatprep.subr.bf16.mxu0 %v3332_v50  ;;  %2823 = vmatprep.subr.bf16.mxu1 %v3873_v5 }
 0x47e   :  { %2799 = vmatpush1.bf16.msra.mxu0 %v3345_v57  ;;  %2825 = vmatpush3.bf16.msra.mxu1 %v3388_v20 }
 0x47f   :  { %2801 = vmatprep.subr.bf16.mxu0 %v3349_v60  ;;  %2826 = vmatprep.subr.bf16.mxu1 %v3873_v5 }
 0x482   :  { %2803 = vmatpush1.bf16.msra.mxu0 %v3362_v4  ;;  %2828 = vmatpush3.bf16.msra.mxu1 %v3395_v23 }
 0x483   :  { %2805 = vmatprep.subr.bf16.mxu0 %v3369_v9  ;;  %2829 = vmatprep.subr.bf16.mxu1 %v3873_v5 }
 0x486   :  { %2807 = vmatpush1.bf16.msra.mxu0 %v3379_v14  ;;  %2831 = vmatpush3.bf16.msra.mxu1 %v3402_v28 }
 0x487   :  { %2833 = vmatprep.subr.bf16.mxu0 %v3270_v7  ;;  %2864 = vmatprep.subr.bf16.mxu1 %v3873_v5 }
 0x53c   :  { %v1248_v62 = vpop.f32.mrb[24].mxu0  ;;  %v1319_v29 = vpop.f32.mrb[16].mxu1 }
 0x53d   :  { %v1326_v8 = vadd.f32 %v1248_v62, %v3480_v1  ;;  %v1250_v27 = vpop.f32.mrb[25].mxu0  ;;  %v2355_v45 = vpop.f32.mrb[17].mxu1  ;;  %v1340_v59 = vadd.f32 %v3525_v43, %v1319_v29  ;;  %v3875_v29 = vld [vmem:[#allocation14_spill] sm:$0xff] }
 0x53e   :  { %v1333_v51 = vadd.f32 %v1250_v27, %v3486_v16 }
 0x53f   :  { %v1996_v38 = vmul.f32 -1.442695, %v1326_v8 }
 0x540   :  { %v1997_v44 = vmul.f32 -1.442695, %v1333_v51 }
 0x541   :  { %3019 = vpow2.f32 %v1996_v38 }
 0x542   :  { %3021 = vpow2.f32 %v1997_v44 }
 0x54b   :  { %v3020_v49 = vpop.eup %3019 }
 0x54c   :  { %v1330_v61 = vadd.f32 1.0, %v3020_v49  ;;  %v3022_v31 = vpop.eup %3021 }
 0x54d   :  { %v1337_v0 = vadd.f32 1.0, %v3022_v31 }
 0x54e   :  { %3023 = vrcp.f32 %v1330_v61 }
 0x54f   :  { %3025 = vrcp.f32 %v1337_v0  ;;  %v3876_v0 = vld [vmem:[#allocation13_spill] sm:$0xff] }
 0x558   :  { %v3024_v2 = vpop.eup %3023 }
 0x559   :  { %v1341_v11 = vmul.f32 %v3024_v2, %v1340_v59  ;;  %v3026_v54 = vpop.eup %3025 }
 0x55a   :  { %v1344_v24 = vsub.f32 1.0, %v3026_v54  ;;  %v1346_v6 = vmul.f32 %v3026_v54, %v3662_v21 }
 0x55b   :  { %v1342_v1 = vadd.f32 %v1341_v11, %v3495_v52 }
 0x55d   :  { %3027 = vtanh.f32 %v1342_v1 }
 0x567   :  { %v3028_v16 = vpop.eup %3027 }
 0x568   :  { %v1345_v37 = vmul.f32 %v3028_v16, %v1344_v24  ;;  %v1861_v16 = vld [vmem:[#allocation8 + $0x18] sm:$0xff] }
 0x56a   :  { %v3706_v32 = vadd.f32 %v1346_v6, %v1345_v37  ;;  %v1862_v6 = vld [vmem:[#allocation8 + $0x20] sm:$0xff] }
 0x56c   :  { %1416 = vmatmul.mubr.f32.vlgmr.msra.gmra.mrb[26].mxu0 %v3706_v32  ;;  %2389 = vmatmul.mubr.f32.vlgmr.msra.gmra.mrb[18].mxu1 %v3706_v32 }
 0x56d   :  { %2835 = vmatpush1.bf16.msra.mxu0 %v3273_v10  ;;  %2866 = vmatpush3.bf16.msra.mxu1 %v3316_v41 }
 0x56e   :  { %2837 = vmatprep.subr.bf16.mxu0 %v3280_v15  ;;  %2867 = vmatprep.subr.bf16.mxu1 %v3873_v5 }
 0x56f   :  { %1584 = vmatprep.mubr.f32.mxu0 %v3874_v22  ;;  %2423 = vmatprep.mubr.msk.f32.mxu1 %vm3162_vm2, %v3874_v22 }
 0x571   :  { %2839 = vmatpush1.bf16.msra.mxu0 %v3283_v18  ;;  %2869 = vmatpush3.bf16.msra.mxu1 %v3325_v46 }
 0x572   :  { %2841 = vmatprep.subr.bf16.mxu0 %v3286_v19  ;;  %2870 = vmatprep.subr.bf16.mxu1 %v3873_v5 }
 0x575   :  { %2843 = vmatpush1.bf16.msra.mxu0 %v3294_v25  ;;  %2872 = vmatpush3.bf16.msra.mxu1 %v3342_v56 }
 0x576   :  { %2845 = vmatprep.subr.bf16.mxu0 %v3297_v26  ;;  %2873 = vmatprep.subr.bf16.mxu1 %v3873_v5 }
 0x579   :  { %2847 = vmatpush1.bf16.msra.mxu0 %v3309_v34  ;;  %2875 = vmatpush3.bf16.msra.mxu1 %v3359_v3 }
 0x57a   :  { %2849 = vmatprep.subr.bf16.mxu0 %v3313_v36  ;;  %2876 = vmatprep.subr.bf16.mxu1 %v3873_v5 }
 0x57d   :  { %2851 = vmatpush1.bf16.msra.mxu0 %v3328_v47  ;;  %2878 = vmatpush3.bf16.msra.mxu1 %v3376_v13 }
 0x57e   :  { %2853 = vmatprep.subr.bf16.mxu0 %v3332_v50  ;;  %2879 = vmatprep.subr.bf16.mxu1 %v3873_v5 }
 0x581   :  { %2855 = vmatpush1.bf16.msra.mxu0 %v3345_v57  ;;  %2881 = vmatpush3.bf16.msra.mxu1 %v3388_v20 }
 0x582   :  { %2857 = vmatprep.subr.bf16.mxu0 %v3349_v60  ;;  %2882 = vmatprep.subr.bf16.mxu1 %v3873_v5 }
 0x585   :  { %2859 = vmatpush1.bf16.msra.mxu0 %v3362_v4  ;;  %2884 = vmatpush3.bf16.msra.mxu1 %v3395_v23 }
 0x586   :  { %2861 = vmatprep.subr.bf16.mxu0 %v3369_v9  ;;  %2885 = vmatprep.subr.bf16.mxu1 %v3873_v5 }
 0x589   :  { %2863 = vmatpush1.bf16.msra.mxu0 %v3379_v14  ;;  %2887 = vmatpush3.bf16.msra.mxu1 %v3402_v28 }
 0x58a   :  { %2889 = vmatprep.subr.bf16.mxu0 %v3270_v7  ;;  %2920 = vmatprep.subr.bf16.mxu1 %v3873_v5 }
 0x63f   :  { %v1417_v52 = vpop.f32.mrb[26].mxu0  ;;  %v1488_v42 = vpop.f32.mrb[18].mxu1 }
 0x640   :  { %v1495_v58 = vadd.f32 %v1417_v52, %v3492_v48  ;;  %v1419_v12 = vpop.f32.mrb[27].mxu0  ;;  %v2390_v62 = vpop.f32.mrb[19].mxu1  ;;  %v1509_v7 = vadd.f32 %v3525_v43, %v1488_v42  ;;  %v1863_v52 = vld [vmem:[#allocation8 + $0x28] sm:$0xff] }
 0x641   :  { %v1502_v8 = vadd.f32 %v1419_v12, %v3875_v29  ;;  %v2951_v42 = vpack.c.bf16 %v1863_v52, %v1862_v6  ;;  %v1866_v62 = vld [vmem:[#allocation8 + $0x40] sm:$0xff]  ;;  %v1867_v29 = vld [vmem:[#allocation8 + $0x48] sm:$0xff] }
 0x642   :  { %v1998_v27 = vmul.f32 -1.442695, %v1495_v58  ;;  %v1864_v58 = vld [vmem:[#allocation8 + $0x30] sm:$0xff] }
 0x643   :  { %v1999_v45 = vmul.f32 -1.442695, %v1502_v8  ;;  %v2957_v8 = vpack.c.bf16 %v1867_v29, %v1866_v62 }
 0x644   :  { %3029 = vpow2.f32 %v1998_v27  ;;  %v1868_v27 = vld [vmem:[#allocation8 + $0x50] sm:$0xff] }
 0x645   :  { %3031 = vpow2.f32 %v1999_v45  ;;  %v1869_v45 = vld [vmem:[#allocation8 + $0x58] sm:$0xff] }
 0x64e   :  { %v3030_v51 = vpop.eup %3029 }
 0x64f   :  { %v1499_v38 = vadd.f32 1.0, %v3030_v51  ;;  %v3032_v44 = vpop.eup %3031  ;;  %v2960_v51 = vpack.c.bf16 %v1869_v45, %v1868_v27 }
 0x650   :  { %v1506_v49 = vadd.f32 1.0, %v3032_v44  ;;  %v1871_v44 = vld [vmem:[#allocation8 + $0x68] sm:$0xff] }
 0x651   :  { %3033 = vrcp.f32 %v1499_v38  ;;  %v1870_v38 = vld [vmem:[#allocation8 + $0x60] sm:$0xff] }
 0x652   :  { %3035 = vrcp.f32 %v1506_v49  ;;  %v2963_v49 = vpack.c.bf16 %v1871_v44, %v1870_v38 }
 0x65b   :  { %v3034_v61 = vpop.eup %3033 }
 0x65c   :  { %v1510_v31 = vmul.f32 %v3034_v61, %v1509_v7  ;;  %v3036_v59 = vpop.eup %3035  ;;  %v1872_v7 = vld [vmem:[#allocation8 + $0x70] sm:$0xff]  ;;  %v1873_v61 = vld [vmem:[#allocation8 + $0x78] sm:$0xff] }
 0x65d   :  { %v1513_v2 = vsub.f32 1.0, %v3036_v59  ;;  %v1515_v54 = vmul.f32 %v3036_v59, %v3706_v32 }
 0x65e   :  { %v1511_v48 = vadd.f32 %v1510_v31, %v3876_v0  ;;  %v2966_v31 = vpack.c.bf16 %v1873_v61, %v1872_v7 }
 0x660   :  { %3037 = vtanh.f32 %v1511_v48 }
 0x66a   :  { %v3038_v11 = vpop.eup %3037 }
 0x66b   :  { %v1514_v1 = vmul.f32 %v3038_v11, %v1513_v2 }
 0x66d   :  { %v3750_v24 = vadd.f32 %v1515_v54, %v1514_v1 }
 0x66f   :  { %1585 = vmatmul.mubr.f32.vlgmr.msra.gmra.mrb[28].mxu0 %v3750_v24  ;;  %2424 = vmatmul.mubr.f32.vlgmr.msra.gmra.mrb[20].mxu1 %v3750_v24 }
 0x670   :  { %2891 = vmatpush1.bf16.msra.mxu0 %v3273_v10  ;;  %2922 = vmatpush3.bf16.msra.mxu1 %v3316_v41 }
 0x671   :  { %2893 = vmatprep.subr.bf16.mxu0 %v3280_v15  ;;  %2923 = vmatprep.subr.bf16.mxu1 %v3873_v5 }
 0x672   :  { %1753 = vmatprep.mubr.f32.mxu0 %v3874_v22  ;;  %2458 = vmatprep.mubr.msk.f32.mxu1 %vm3162_vm2, %v3874_v22 }
 0x674   :  { %2895 = vmatpush1.bf16.msra.mxu0 %v3283_v18  ;;  %2925 = vmatpush3.bf16.msra.mxu1 %v3325_v46 }
 0x675   :  { %2897 = vmatprep.subr.bf16.mxu0 %v3286_v19  ;;  %2926 = vmatprep.subr.bf16.mxu1 %v3873_v5 }
 0x678   :  { %2899 = vmatpush1.bf16.msra.mxu0 %v3294_v25  ;;  %2928 = vmatpush3.bf16.msra.mxu1 %v3342_v56 }
 0x679   :  { %2901 = vmatprep.subr.bf16.mxu0 %v3297_v26  ;;  %2929 = vmatprep.subr.bf16.mxu1 %v3873_v5 }
 0x67c   :  { %2903 = vmatpush1.bf16.msra.mxu0 %v3309_v34  ;;  %2931 = vmatpush3.bf16.msra.mxu1 %v3359_v3 }
 0x67d   :  { %2905 = vmatprep.subr.bf16.mxu0 %v3313_v36  ;;  %2932 = vmatprep.subr.bf16.mxu1 %v3873_v5 }
 0x680   :  { %2907 = vmatpush1.bf16.msra.mxu0 %v3328_v47  ;;  %2934 = vmatpush3.bf16.msra.mxu1 %v3376_v13 }
 0x681   :  { %2909 = vmatprep.subr.bf16.mxu0 %v3332_v50  ;;  %2935 = vmatprep.subr.bf16.mxu1 %v3873_v5 }
 0x684   :  { %2911 = vmatpush1.bf16.msra.mxu0 %v3345_v57  ;;  %2937 = vmatpush3.bf16.msra.mxu1 %v3388_v20 }
 0x685   :  { %2913 = vmatprep.subr.bf16.mxu0 %v3349_v60  ;;  %2938 = vmatprep.subr.bf16.mxu1 %v3873_v5 }
 0x688   :  { %2915 = vmatpush1.bf16.msra.mxu0 %v3362_v4  ;;  %2940 = vmatpush3.bf16.msra.mxu1 %v3395_v23 }
 0x689   :  { %2917 = vmatprep.subr.bf16.mxu0 %v3369_v9  ;;  %2941 = vmatprep.subr.bf16.mxu1 %v3873_v5 }
 0x68c   :  { %2919 = vmatpush1.bf16.msra.mxu0 %v3379_v14  ;;  %2943 = vmatpush3.bf16.msra.mxu1 %v3402_v28  ;;  %v1858_v28 = vld [vmem:[#allocation8] sm:$0xff] }
 0x68d   :  { %2944 = vmatprep.subr.bf16.mxu0 %v3873_v5 }
 0x742   :  { %v1586_v10 = vpop.f32.mrb[28].mxu0  ;;  %v1657_v15 = vpop.f32.mrb[20].mxu1 }
 0x743   :  { %v1664_v18 = vadd.f32 %v1586_v10, %v3504_v35  ;;  %v1588_v19 = vpop.f32.mrb[29].mxu0  ;;  %v2425_v25 = vpop.f32.mrb[21].mxu1  ;;  %v1678_v56 = vadd.f32 %v3525_v43, %v1657_v15  ;;  %v1859_v35 = vld [vmem:[#allocation8 + $0x8] sm:$0xff] }
 0x744   :  { %v1671_v26 = vadd.f32 %v1588_v19, %v3511_v30  ;;  %v2945_v30 = vpack.c.bf16 %v1859_v35, %v1858_v28 }
 0x745   :  { %v2000_v34 = vmul.f32 -1.442695, %v1664_v18 }
 0x746   :  { %v2001_v36 = vmul.f32 -1.442695, %v1671_v26 }
 0x747   :  { %3039 = vpow2.f32 %v2000_v34 }
 0x748   :  { %3041 = vpow2.f32 %v2001_v36  ;;  %v672_v36 = vld [vmem:[%s3863_s6] sm:$0xff] }
 0x751   :  { %v3040_v41 = vpop.eup %3039 }
 0x752   :  { %v1668_v46 = vadd.f32 1.0, %v3040_v41  ;;  %v3042_v47 = vpop.eup %3041  ;;  %v1010_v41 = vld [vmem:[%s3863_s6 + $0x10] sm:$0xff] }
 0x753   :  { %v1675_v50 = vadd.f32 1.0, %v3042_v47  ;;  %v673_v47 = vmul.f32 %v672_v36, %v3530_v40  ;;  %v1686_v40 = vld [vmem:[%s3863_s6 + $0x30] sm:$0xff] }
 0x754   :  { %3043 = vrcp.f32 %v1668_v46  ;;  %v1179_v46 = vld [vmem:[%s3863_s6 + $0x18] sm:$0xff] }
 0x755   :  { %3045 = vrcp.f32 %v1675_v50  ;;  %v1011_v50 = vmul.f32 %v1010_v41, %v3618_v33 }
 0x75e   :  { %v3044_v57 = vpop.eup %3043 }
 0x75f   :  { %v1679_v60 = vmul.f32 %v3044_v57, %v1678_v56  ;;  %v3046_v4 = vpop.eup %3045  ;;  %v1180_v57 = vmul.f32 %v1179_v46, %v3662_v21 }
 0x760   :  { %v1682_v9 = vsub.f32 1.0, %v3046_v4  ;;  %v1684_v20 = vmul.f32 %v3046_v4, %v3750_v24 }
 0x761   :  { %v1680_v3 = vadd.f32 %v1679_v60, %v3508_v55  ;;  %v1860_v55 = vld [vmem:[#allocation8 + $0x10] sm:$0xff] }
 0x762   :  { %v2948_v37 = vpack.c.bf16 %v1861_v16, %v1860_v55 }
 0x763   :  { %3047 = vtanh.f32 %v1680_v3 }
 0x76d   :  { %v3048_v13 = vpop.eup %3047 }
 0x76e   :  { %v1683_v14 = vmul.f32 %v3048_v13, %v1682_v9 }
 0x770   :  { %v3793_v23 = vadd.f32 %v1684_v20, %v1683_v14 }
 0x772   :  { %1754 = vmatmul.mubr.f32.vlgmr.msra.gmra.mrb[30].mxu0 %v3793_v23  ;;  %2459 = vmatmul.mubr.f32.vlgmr.msra.gmra.mrb[22].mxu1 %v3793_v23  ;;  %v1687_v21 = vmul.f32 %v1686_v40, %v3793_v23 }
 0x773   :  { %2493 = vmatprep.mubr.msk.f32.mxu0 %vm3162_vm2, %v3874_v22  ;;  %2946 = vmatpush3.bf16.msra.mxu0 %v2945_v30  ;;  %v1865_v22 = vld [vmem:[#allocation8 + $0x38] sm:$0xff]  ;;  %v1855_v30 = vld [vmem:[%s3863_s6 + $0x38] sm:$0xff] }
 0x774   :  { %2947 = vmatprep.subr.bf16.mxu0 %v3873_v5  ;;  %v2954_v12 = vpack.c.bf16 %v1865_v22, %v1864_v58 }
 0x777   :  { %2949 = vmatpush3.bf16.msra.mxu0 %v2948_v37 }
 0x778   :  { %2950 = vmatprep.subr.bf16.mxu0 %v3873_v5 }
 0x77b   :  { %2952 = vmatpush3.bf16.msra.mxu0 %v2951_v42 }
 0x77c   :  { %2953 = vmatprep.subr.bf16.mxu0 %v3873_v5 }
 0x77f   :  { %2955 = vmatpush3.bf16.msra.mxu0 %v2954_v12 }
 0x780   :  { %2956 = vmatprep.subr.bf16.mxu0 %v3873_v5 }
 0x783   :  { %2958 = vmatpush3.bf16.msra.mxu0 %v2957_v8 }
 0x784   :  { %2959 = vmatprep.subr.bf16.mxu0 %v3873_v5 }
 0x787   :  { %2961 = vmatpush3.bf16.msra.mxu0 %v2960_v51 }
 0x788   :  { %2962 = vmatprep.subr.bf16.mxu0 %v3873_v5 }
 0x78b   :  { %2964 = vmatpush3.bf16.msra.mxu0 %v2963_v49 }
 0x78c   :  { %2965 = vmatprep.subr.bf16.mxu0 %v3873_v5 }
 0x78f   :  { %2967 = vmatpush3.bf16.msra.mxu0 %v2966_v31 }
 0x845   :  { %v1755_v0 = vpop.f32.mrb[30].mxu0  ;;  %v1826_v48 = vpop.f32.mrb[22].mxu1 }
 0x846   :  { %v1833_v59 = vadd.f32 %v1755_v0, %v3515_v53  ;;  %v1757_v2 = vpop.f32.mrb[31].mxu0  ;;  %v2460_v11 = vpop.f32.mrb[23].mxu1  ;;  %v1847_v5 = vadd.f32 %v3525_v43, %v1826_v48  ;;  %v841_v53 = vld [vmem:[%s3863_s6 + $0x8] sm:$0xff] }
 0x847   :  { %v1840_v1 = vadd.f32 %v1757_v2, %v3519_v63  ;;  %v842_v43 = vmul.f32 %v841_v53, %v3574_v39  ;;  %v1517_v39 = vld [vmem:[%s3863_s6 + $0x28] sm:$0xff] }
 0x848   :  { %v2002_v54 = vmul.f32 -1.442695, %v1833_v59  ;;  %v1518_v9 = vmul.f32 %v1517_v39, %v3750_v24  ;;  %v2004_v24 = vld [vmem:[%s3865_s8] ss:$0 sm:$0xff] }
 0x849   :  { %v2003_v10 = vmul.f32 -1.442695, %v1840_v1  ;;  %v843_v56 = vadd.f32 %v842_v43, %v673_v47 }
 0x84a   :  { %3049 = vpow2.f32 %v2002_v54 }
 0x84b   :  { %3051 = vpow2.f32 %v2003_v10  ;;  %v1012_v3 = vadd.f32 %v1011_v50, %v843_v56 }
 0x84d   :  { %v1181_v33 = vadd.f32 %v1180_v57, %v1012_v3 }
 0x854   :  { %v3050_v15 = vpop.eup %3049 }
 0x855   :  { %v1837_v18 = vadd.f32 1.0, %v3050_v15  ;;  %v3052_v19 = vpop.eup %3051 }
 0x856   :  { %v1844_v25 = vadd.f32 1.0, %v3052_v19 }
 0x857   :  { %3053 = vrcp.f32 %v1837_v18 }
 0x858   :  { %3055 = vrcp.f32 %v1844_v25 }
 0x861   :  { %v3054_v26 = vpop.eup %3053 }
 0x862   :  { %v1848_v34 = vmul.f32 %v3054_v26, %v1847_v5  ;;  %v3056_v60 = vpop.eup %3055 }
 0x863   :  { %v1851_v13 = vsub.f32 1.0, %v3056_v60  ;;  %v1853_v35 = vmul.f32 %v3056_v60, %v3793_v23 }
 0x864   :  { %v1849_v63 = vadd.f32 %v1848_v34, %v3501_v17  ;;  %v1348_v17 = vld [vmem:[%s3863_s6 + $0x20] sm:$0xff] }
 0x865   :  { %v1349_v4 = vmul.f32 %v1348_v17, %v3706_v32 }
 0x866   :  { %3057 = vtanh.f32 %v1849_v63 }
 0x867   :  { %v1350_v20 = vadd.f32 %v1349_v4, %v1181_v33 }
 0x869   :  { %v1519_v32 = vadd.f32 %v1518_v9, %v1350_v20 }
 0x86b   :  { %v1688_v16 = vadd.f32 %v1687_v21, %v1519_v32 }
 0x870   :  { %v3058_v14 = vpop.eup %3057 }
 0x871   :  { %v1852_v28 = vmul.f32 %v3058_v14, %v1851_v13 }
 0x873   :  { %v1854_v55 = vadd.f32 %v1853_v35, %v1852_v28 }
 0x875   :  { %v1856_v37 = vmul.f32 %v1855_v30, %v1854_v55 }
 0x877   :  { %v1857_v6 = vadd.f32 %v1856_v37, %v1688_v16 }
 0x879   :  { %2494 = vmatmul.mubr.f32.vlgmr.msra.gmra.mrb[32].mxu0 %v1857_v6 }
 0x94c   :  { %v1947_v52 = vpop.f32.mrb[32].mxu0 }
 0x94d   :  { %v1948_v42 = vadd.f32 %v2004_v24, %v1947_v52  ;;  %v2495_v58 = vpop.f32.mrb[33].mxu0 }
 0x94f   :  { %1951 = vst [vmem:[#allocation9] sm:$0xff] %v1948_v42 }
 0x950   :  { %3136 = shalt.err (!%p3133_p0)
}
 0x951   :  { %s3137_s25 = scalar_lea.hbm %s3866_s9, 128 }
 0x952   :  { %p3138_p1 = scmp.ne.s32.totalorder %s3866_s9, %s3137_s25  ;;  %p3141_p2 = scmp.lt.u32.totalorder %s3137_s25, %s3866_s9 }
 0x954   :  { %p3143_p3 = pnand %p3141_p2, %p3138_p1 }
 0x956   :  { %3146 = shalt.err (!%p3143_p3)
}
 0x957   :  { %1961 = dma.vmem_to_hbm [thread:$0]  %s1959_s20, 128, %s3866_s9, [#allocation5]  }
 0x958   :  { %3151 = dma.done.wait [#allocation5], 128  }
 0x959   :  { %3152 = vsyncadd [#allocation5], 4294967168 }
 0x95a   :  { %1965 = vsyncpa [#allocation4], 1 }
 0x95b   :  { %1966 = vsyncpa [#allocation7], 1 }
 0x95c   :  { %1967 = vsyncpa [#allocation5], 1 }

</bundles_post_ra>
